<compile_context>
chip_gen: v7x
topology: tpu7x:2x2x1
jax: 0.10.0
libtpu: 0.0.40
codegen_flags: <defaults>
</compile_context>

<pallas_src>
import functools
import math

import jax
import jax.numpy as jnp
from jax.experimental import pallas as pl
from jax.experimental.pallas import tpu as pltpu

# ----- small synthetic config (mirrors LLmPConfig fields) -----
HIDDEN = 32          # config.hidden_size
N_HEADS = 4          # config.n_heads
HEAD_DIM = HIDDEN // N_HEADS
N_LAYERS = 2         # config.n_layers
VOCAB = 64           # config.vocab_size
FFN_MULT = 4
EPS = 1e-5           # config.eps

NEG_INF = -1e9


def _vmem_limit_bytes():
    """Generation-aware scoped-VMEM budget: ~75% of physical capacity."""
    try:
        cap = getattr(pltpu.get_tpu_info(), "vmem_capacity_bytes", None)
        if cap:
            return (int(cap) * 3) // 4       # ~48 MiB on v7x, ~96 MiB on v5e/v6e
    except Exception:
        pass
    return 48 * 1024 * 1024                  # conservative fallback (fits v7x)


VMEM_LIMIT = _vmem_limit_bytes()


def _tile(dim, pref, align):
    """Largest tile <= pref that divides `dim` and is `align`-aligned, else full dim."""
    if dim <= pref:
        return dim
    t = (pref // align) * align
    while t >= align:
        if dim % t == 0:
            return t
        t -= align
    return dim


# ---------------------------------------------------------------------------
# Pallas kernels
# ---------------------------------------------------------------------------
def _rmsnorm_kernel(x_ref, g_ref, o_ref, *, eps):
    x = x_ref[...].astype(jnp.float32)
    var = jnp.mean(x * x, axis=-1, keepdims=True)
    o_ref[...] = ((x * jax.lax.rsqrt(var + eps)) * g_ref[...]).astype(o_ref.dtype)


def _rms_matmul_kernel(x_ref, g_ref, w_ref, o_ref, xn_ref, *, eps):
    """Fused RMSNorm -> matmul.  Norm computed once per row tile (at j == 0),
    cached in VMEM scratch, reused for every N tile.  bf16 MXU, f32 accumulate."""
    @pl.when(pl.program_id(1) == 0)
    def _():
        x = x_ref[...].astype(jnp.float32)
        var = jnp.mean(x * x, axis=-1, keepdims=True)
        xn_ref[...] = ((x * jax.lax.rsqrt(var + eps)) * g_ref[...]).astype(jnp.bfloat16)

    o_ref[...] = jnp.dot(
        xn_ref[...], w_ref[...], preferred_element_type=jnp.float32
    ).astype(o_ref.dtype)


def _rms_ffn_kernel(x_ref, g_ref, wu_ref, wd_ref, o_ref, *, eps):
    """Fused: x + down( GELU( up( RMSNorm(x) ) ) )  (residual add fused in)."""
    x = x_ref[...].astype(jnp.float32)
    var = jnp.mean(x * x, axis=-1, keepdims=True)
    xn = ((x * jax.lax.rsqrt(var + eps)) * g_ref[...]).astype(jnp.bfloat16)
    h = jnp.dot(xn, wu_ref[...], preferred_element_type=jnp.float32)
    # tanh-approx GELU (lowers to EUP); reference FeedForward source unavailable.
    h = jax.nn.gelu(h, approximate=True)
    d = jnp.dot(h.astype(jnp.bfloat16), wd_ref[...], preferred_element_type=jnp.float32)
    o_ref[...] = (x + d).astype(o_ref.dtype)


def _attention_kernel(res_ref, qkv_ref, alibi_ref, mask_ref, wo_ref, o_ref,
                      *, num_heads, head_dim):
    """One batch element per grid step; all heads batched in single einsums.
    Q columns of w_qkv are pre-scaled by 1/sqrt(head_dim) at init."""
    S = qkv_ref.shape[1]
    D = num_heads * head_dim

    qkv = qkv_ref[0]                                          # (S, 3D) bf16
    q = jnp.swapaxes(qkv[:, 0 * D:1 * D].reshape(S, num_heads, head_dim), 0, 1)
    k = jnp.swapaxes(qkv[:, 1 * D:2 * D].reshape(S, num_heads, head_dim), 0, 1)
    v = jnp.swapaxes(qkv[:, 2 * D:3 * D].reshape(S, num_heads, head_dim), 0, 1)
    # q/k/v: (H, S, Dh)

    alibi = alibi_ref[0].astype(jnp.float32)                  # (H, S)
    pad = (1.0 - mask_ref[0].astype(jnp.float32)) * NEG_INF   # (1, S)

    # causal + padding bias built in-kernel (no O(S^2) HBM tensor)
    row = jax.lax.broadcasted_iota(jnp.int32, (S, S), 0)
    col = jax.lax.broadcasted_iota(jnp.int32, (S, S), 1)
    base = jnp.where(col <= row, 0.0, NEG_INF).astype(jnp.float32) + pad   # (S, S)

    # all heads in one batched contraction (no per-head unroll)
    s = jnp.einsum('hqd,hkd->hqk', q, k, preferred_element_type=jnp.float32)
    s = s + alibi[:, None, :] + base[None, :, :]              # (H, S, S)

    m = jnp.max(s, axis=-1, keepdims=True)
    p = jnp.exp(s - m)
    p = p * pl.reciprocal(jnp.sum(p, axis=-1, keepdims=True), approx=True)

    ctx = jnp.einsum('hqk,hkd->hqd', p.astype(jnp.bfloat16), v,
                     preferred_element_type=jnp.float32)       # (H, S, Dh)
    ctx = jnp.swapaxes(ctx, 0, 1).reshape(S, D)                # (S, D)
    proj = jnp.dot(ctx.astype(jnp.bfloat16), wo_ref[...],
                   preferred_element_type=jnp.float32)         # (S, D)

    # fused residual add, single lane-dense store
    o_ref[0] = (res_ref[0].astype(jnp.float32) + proj).astype(o_ref.dtype)


# ---------------------------------------------------------------------------
# Pallas wrappers
# ---------------------------------------------------------------------------
def rmsnorm(x2d, gain, eps=EPS, out_dtype=jnp.bfloat16):
    M, D = x2d.shape
    tm = _tile(M, 1024, 16)
    g2 = gain.reshape(1, D).astype(jnp.float32)
    return pl.pallas_call(
        functools.partial(_rmsnorm_kernel, eps=eps),
        out_shape=jax.ShapeDtypeStruct((M, D), out_dtype),
        grid=(M // tm,),
        in_specs=[pl.BlockSpec((tm, D), lambda i: (i, 0)),
                  pl.BlockSpec((1, D), lambda i: (0, 0))],
        out_specs=pl.BlockSpec((tm, D), lambda i: (i, 0)),
        compiler_params=pltpu.CompilerParams(
            dimension_semantics=("parallel",), vmem_limit_bytes=VMEM_LIMIT),
    )(x2d, g2)


def rms_linear(x2d, gain, w_t, eps=EPS, out_dtype=jnp.bfloat16):
    """fused RMSNorm(x) @ w_t.  x2d: (M, K), w_t: (K, N) pre-transposed bf16."""
    M, K = x2d.shape
    N = w_t.shape[1]
    tm = _tile(M, 512, 16)
    tn = _tile(N, 512, 128)
    g2 = gain.reshape(1, K).astype(jnp.float32)
    return pl.pallas_call(
        functools.partial(_rms_matmul_kernel, eps=eps),
        out_shape=jax.ShapeDtypeStruct((M, N), out_dtype),
        grid=(M // tm, N // tn),
        in_specs=[
            pl.BlockSpec((tm, K), lambda i, j: (i, 0)),
            pl.BlockSpec((1, K), lambda i, j: (0, 0)),
            pl.BlockSpec((K, tn), lambda i, j: (0, j)),
        ],
        out_specs=pl.BlockSpec((tm, tn), lambda i, j: (i, j)),
        scratch_shapes=[pltpu.VMEM((tm, K), jnp.bfloat16)],
        compiler_params=pltpu.CompilerParams(
            dimension_semantics=("parallel", "arbitrary"),
            vmem_limit_bytes=VMEM_LIMIT),
    )(x2d, g2, w_t)


def rms_ffn_residual(x2d, gain, w_up_t, w_down_t, eps=EPS):
    """x + FFN(RMSNorm(x)) with the residual add fused into the kernel."""
    M, D = x2d.shape
    F = w_up_t.shape[1]
    tm = _tile(M, 512, 16)
    g2 = gain.reshape(1, D).astype(jnp.float32)
    return pl.pallas_call(
        functools.partial(_rms_ffn_kernel, eps=eps),
        out_shape=jax.ShapeDtypeStruct((M, D), jnp.bfloat16),
        grid=(M // tm,),
        in_specs=[
            pl.BlockSpec((tm, D), lambda i: (i, 0)),
            pl.BlockSpec((1, D), lambda i: (0, 0)),
            pl.BlockSpec((D, F), lambda i: (0, 0)),
            pl.BlockSpec((F, D), lambda i: (0, 0)),
        ],
        out_specs=pl.BlockSpec((tm, D), lambda i: (i, 0)),
        compiler_params=pltpu.CompilerParams(
            dimension_semantics=("parallel",), vmem_limit_bytes=VMEM_LIMIT),
    )(x2d, g2, w_up_t, w_down_t)


def attention_residual(x, layer, alibi, attn_mask):
    """x + Attention(ln1(x)).  x: (B,S,D) bf16; alibi: (B,H,S); mask: (B,S)."""
    B, S, D = x.shape
    # fused ln1 + concatenated QKV projection (Q pre-scaled at init) -> bf16
    qkv = rms_linear(x.reshape(B * S, D), layer["ln1"], layer["w_qkv"],
                     out_dtype=jnp.bfloat16).reshape(B, S, 3 * D)
    mask3 = attn_mask.reshape(B, 1, S).astype(jnp.float32)

    return pl.pallas_call(
        functools.partial(_attention_kernel, num_heads=N_HEADS, head_dim=HEAD_DIM),
        out_shape=jax.ShapeDtypeStruct((B, S, D), jnp.bfloat16),
        grid=(B,),
        in_specs=[
            pl.BlockSpec((1, S, D), lambda b: (b, 0, 0)),        # residual x
            pl.BlockSpec((1, S, 3 * D), lambda b: (b, 0, 0)),    # qkv
            pl.BlockSpec((1, N_HEADS, S), lambda b: (b, 0, 0)),  # alibi rows
            pl.BlockSpec((1, 1, S), lambda b: (b, 0, 0)),        # padding mask
            pl.BlockSpec((D, D), lambda b: (0, 0)),              # w_o (bf16)
        ],
        out_specs=pl.BlockSpec((1, S, D), lambda b: (b, 0, 0)),
        compiler_params=pltpu.CompilerParams(
            dimension_semantics=("parallel",), vmem_limit_bytes=VMEM_LIMIT),
    )(x, qkv, alibi, mask3, layer["w_o"])


# ---------------------------------------------------------------------------
# Plain-JAX glue: alibi, params, full forward
# ---------------------------------------------------------------------------
def build_alibi_tensor(attention_mask, n_heads, dtype=jnp.float32):
    """BLOOM-style alibi.  attention_mask: (B, S) float of {0,1}.  Returns (B, H, S)."""
    closest_pow2 = 2 ** int(math.floor(math.log2(n_heads)))
    base = 2.0 ** (-(2.0 ** -(math.log2(closest_pow2) - 3)))
    powers = jnp.arange(1, 1 + closest_pow2, dtype=jnp.float32)
    slopes = jnp.power(base, powers)
    if closest_pow2 != n_heads:
        extra_base = 2.0 ** (-(2.0 ** -(math.log2(2 * closest_pow2) - 3)))
        num_rem = min(closest_pow2, n_heads - closest_pow2)
        extra_powers = jnp.arange(1, 1 + 2 * num_rem, 2, dtype=jnp.float32)
        slopes = jnp.concatenate([slopes, jnp.power(extra_base, extra_powers)], axis=0)
    arange_tensor = (
        (jnp.cumsum(attention_mask, axis=-1) - 1.0) * attention_mask
    )[:, None, :]                                    # (B, 1, S)
    alibi = slopes[None, :, None] * arange_tensor    # (B, H, S)
    return alibi.astype(dtype)


def init_params(key):
    """Deterministic init matching LLmP._init_weights (normal std=0.002, RMS weight=1).

    Matmul weights are pre-transposed (in_features, out_features) and stored bf16.
    The Q columns of w_qkv are pre-scaled by 1/sqrt(head_dim) (score scale folded)."""
    keys = jax.random.split(key, 2 + N_LAYERS * 6)

    def normal(k, shape, dtype=jnp.float32):
        return (0.002 * jax.random.normal(k, shape, jnp.float32)).astype(dtype)

    scale = 1.0 / math.sqrt(HEAD_DIM)
    params = {
        "wte": normal(keys[0], (VOCAB, HIDDEN)),
        "wte_ln": jnp.ones((HIDDEN,), jnp.float32),
        "ln": jnp.ones((HIDDEN,), jnp.float32),
        "w_head": normal(keys[1], (HIDDEN, VOCAB), jnp.bfloat16),
        "layers": [],
    }
    kidx = 2
    for _ in range(N_LAYERS):
        wq = normal(keys[kidx + 0], (HIDDEN, HIDDEN)) * scale   # fold 1/sqrt(Dh) into Q
        wk = normal(keys[kidx + 1], (HIDDEN, HIDDEN))
        wv = normal(keys[kidx + 2], (HIDDEN, HIDDEN))
        layer = {
            "ln1": jnp.ones((HIDDEN,), jnp.float32),
            "ln2": jnp.ones((HIDDEN,), jnp.float32),
            "w_qkv": jnp.concatenate([wq, wk, wv], axis=1).astype(jnp.bfloat16),
            "w_o": normal(keys[kidx + 3], (HIDDEN, HIDDEN), jnp.bfloat16),
            "w_up": normal(keys[kidx + 4], (HIDDEN, FFN_MULT * HIDDEN), jnp.bfloat16),
            "w_down": normal(keys[kidx + 5], (FFN_MULT * HIDDEN, HIDDEN), jnp.bfloat16),
        }
        kidx += 6
        params["layers"].append(layer)
    return params


def llmp_forward(params, input_ids, attention_mask=None, labels=None):
    B, S = input_ids.shape
    if attention_mask is None:
        attention_mask = jnp.ones((B, S), jnp.float32)
    attention_mask = attention_mask.astype(jnp.float32)          # (B, S)
    alibi = build_alibi_tensor(attention_mask, N_HEADS)          # (B, H, S)

    x = params["wte"][input_ids]                                 # embedding gather (f32)
    # wte_ln -> bf16 residual stream (dropout is an eval-mode no-op)
    x = rmsnorm(x.reshape(B * S, HIDDEN), params["wte_ln"]).reshape(B, S, HIDDEN)

    for layer in params["layers"]:
        # hidden = hidden + Attention(ln1(hidden))   (ln1 + residual fused)
        x = attention_residual(x, layer, alibi, attention_mask)
        # hidden = hidden + FFN(ln2(hidden))         (ln2 + residual fused)
        x = rms_ffn_residual(x.reshape(B * S, HIDDEN), layer["ln2"],
                             layer["w_up"], layer["w_down"]).reshape(B, S, HIDDEN)

    # logits = out(ln(x))  (final ln fused into LM head matmul, f32 logits)
    logits = rms_linear(x.reshape(B * S, HIDDEN), params["ln"], params["w_head"],
                        out_dtype=jnp.float32).reshape(B, S, VOCAB)

    loss = None
    if labels is not None:
        shift_logits = logits[:, :-1, :]
        shift_labels = labels[:, 1:]
        logp = jax.nn.log_softmax(shift_logits, axis=-1)
        nll = -jnp.take_along_axis(logp, shift_labels[..., None], axis=-1)[..., 0]
        loss = jnp.mean(nll)
    return logits, loss


if __name__ == "__main__":
    key = jax.random.PRNGKey(0)
    pkey, ikey = jax.random.split(key)
    params = init_params(pkey)

    B, S = 2, 8
    input_ids = jax.random.randint(ikey, (B, S), 0, VOCAB)
    attention_mask = jnp.ones((B, S), jnp.float32)

    forward = jax.jit(llmp_forward)
    logits, loss = forward(params, input_ids, attention_mask)
    logits = jax.block_until_ready(logits)

    assert logits.shape == (B, S, VOCAB), logits.shape
    assert bool(jnp.all(jnp.isfinite(logits)))
    print("KERNEL_OK")
</pallas_src>

<mosaic_0001>
module attributes {stable_mosaic.version = 11 : i64} {
  func.func @_rmsnorm_kernel(%arg0: i32, %arg1: memref<16x32xf32, #tpu.memory_space<vmem>>, %arg2: memref<1x32xf32, #tpu.memory_space<vmem>>, %arg3: memref<16x32xbf16, #tpu.memory_space<vmem>>) attributes {dimension_semantics = [#tpu.dimension_semantics<parallel>], iteration_bounds = array<i64: 1>, scalar_prefetch = 0 : i64, scratch_operands = 0 : i64, tpu.core_type = #tpu.core_type<tc>, window_params = [{transform_indices = @transform_0, window_bounds = array<i64: 16, 32>}, {pipeline_mode = #tpu.pipeline_mode<synchronous>, transform_indices = @transform_1, window_bounds = array<i64: 1, 32>}, {transform_indices = @transform_2, window_bounds = array<i64: 16, 32>}]} {
    %c0 = arith.constant 0 : index
    %c0_0 = arith.constant 0 : index
    %0 = vector.load %arg1[%c0, %c0_0] : memref<16x32xf32, #tpu.memory_space<vmem>>, vector<16x32xf32>
    %1 = arith.mulf %0, %0 : vector<16x32xf32>
    %cst = arith.constant dense<0.000000e+00> : vector<16xf32>
    %2 = vector.multi_reduction <add>, %1, %cst [1] : vector<16x32xf32> to vector<16xf32>
    %3 = vector.shape_cast %2 : vector<16xf32> to vector<16x1xf32>
    %cst_1 = arith.constant 3.200000e+01 : f32
    %4 = vector.broadcast %cst_1 : f32 to vector<16x1xf32>
    %5 = arith.divf %3, %4 : vector<16x1xf32>
    %cst_2 = arith.constant 9.99999974E-6 : f32
    %6 = vector.broadcast %cst_2 : f32 to vector<16x1xf32>
    %7 = arith.addf %5, %6 : vector<16x1xf32>
    %8 = math.rsqrt %7 : vector<16x1xf32>
    %9 = vector.broadcast %8 : vector<16x1xf32> to vector<16x32xf32>
    %10 = arith.mulf %0, %9 : vector<16x32xf32>
    %c0_3 = arith.constant 0 : index
    %c0_4 = arith.constant 0 : index
    %11 = vector.load %arg2[%c0_3, %c0_4] : memref<1x32xf32, #tpu.memory_space<vmem>>, vector<1x32xf32>
    %12 = vector.broadcast %11 : vector<1x32xf32> to vector<16x32xf32>
    %13 = arith.mulf %10, %12 : vector<16x32xf32>
    %14 = arith.truncf %13 : vector<16x32xf32> to vector<16x32xbf16>
    %c0_5 = arith.constant 0 : index
    %c0_6 = arith.constant 0 : index
    %15 = vector.load %arg3[%c0_5, %c0_6] : memref<16x32xbf16, #tpu.memory_space<vmem>>, vector<16x32xbf16>
    tpu.vector_store %arg3[%c0_5, %c0_6], %14 {strides = array<i32>} : memref<16x32xbf16, #tpu.memory_space<vmem>>, vector<16x32xbf16>,
    return
  }
  func.func @transform_0(%arg0: i32) -> (i32, i32) {
    %c0_i32 = arith.constant 0 : i32
    %c0_i32_0 = arith.constant 0 : i32
    return %arg0, %c0_i32 : i32, i32
  }
  func.func @transform_1(%arg0: i32) -> (i32, i32) {
    %c0_i32 = arith.constant 0 : i32
    %c0_i32_0 = arith.constant 0 : i32
    %c0_i32_1 = arith.constant 0 : i32
    return %c0_i32, %c0_i32_0 : i32, i32
  }
  func.func @transform_2(%arg0: i32) -> (i32, i32) {
    %c0_i32 = arith.constant 0 : i32
    %c0_i32_0 = arith.constant 0 : i32
    return %arg0, %c0_i32 : i32, i32
  }
}

module attributes {stable_mosaic.version = 11 : i64} {
  func.func @_rms_matmul_kernel(%arg0: i32, %arg1: i32, %arg2: memref<16x32xbf16, #tpu.memory_space<vmem>>, %arg3: memref<1x32xf32, #tpu.memory_space<vmem>>, %arg4: memref<32x96xbf16, #tpu.memory_space<vmem>>, %arg5: memref<16x96xbf16, #tpu.memory_space<vmem>>, %arg6: memref<16x32xbf16, #tpu.memory_space<vmem>>) attributes {dimension_semantics = [#tpu.dimension_semantics<parallel>, #tpu.dimension_semantics<arbitrary>], iteration_bounds = array<i64: 1, 1>, scalar_prefetch = 0 : i64, scratch_operands = 1 : i64, tpu.core_type = #tpu.core_type<tc>, window_params = [{transform_indices = @transform_0, window_bounds = array<i64: 16, 32>}, {pipeline_mode = #tpu.pipeline_mode<synchronous>, transform_indices = @transform_1, window_bounds = array<i64: 1, 32>}, {transform_indices = @transform_2, window_bounds = array<i64: 32, 96>}, {transform_indices = @transform_3, window_bounds = array<i64: 16, 96>}]} {
    %c0_i32 = arith.constant 0 : i32
    %0 = arith.cmpi eq, %arg1, %c0_i32 : i32
    %1 = arith.extui %0 : i1 to i32
    %c0_i32_0 = arith.constant 0 : i32
    %2 = arith.cmpi ne, %1, %c0_i32_0 : i32
    scf.if %2 {
      %c0_6 = arith.constant 0 : index
      %c0_7 = arith.constant 0 : index
      %8 = vector.load %arg2[%c0_6, %c0_7] : memref<16x32xbf16, #tpu.memory_space<vmem>>, vector<16x32xbf16>
      %9 = arith.extf %8 : vector<16x32xbf16> to vector<16x32xf32>
      %10 = arith.mulf %9, %9 : vector<16x32xf32>
      %cst_8 = arith.constant dense<0.000000e+00> : vector<16xf32>
      %11 = vector.multi_reduction <add>, %10, %cst_8 [1] : vector<16x32xf32> to vector<16xf32>
      %12 = vector.shape_cast %11 : vector<16xf32> to vector<16x1xf32>
      %cst_9 = arith.constant 3.200000e+01 : f32
      %13 = vector.broadcast %cst_9 : f32 to vector<16x1xf32>
      %14 = arith.divf %12, %13 : vector<16x1xf32>
      %cst_10 = arith.constant 9.99999974E-6 : f32
      %15 = vector.broadcast %cst_10 : f32 to vector<16x1xf32>
      %16 = arith.addf %14, %15 : vector<16x1xf32>
      %17 = math.rsqrt %16 : vector<16x1xf32>
      %18 = vector.broadcast %17 : vector<16x1xf32> to vector<16x32xf32>
      %19 = arith.mulf %9, %18 : vector<16x32xf32>
      %c0_11 = arith.constant 0 : index
      %c0_12 = arith.constant 0 : index
      %20 = vector.load %arg3[%c0_11, %c0_12] : memref<1x32xf32, #tpu.memory_space<vmem>>, vector<1x32xf32>
      %21 = vector.broadcast %20 : vector<1x32xf32> to vector<16x32xf32>
      %22 = arith.mulf %19, %21 : vector<16x32xf32>
      %23 = arith.truncf %22 : vector<16x32xf32> to vector<16x32xbf16>
      %c0_13 = arith.constant 0 : index
      %c0_14 = arith.constant 0 : index
      %24 = vector.load %arg6[%c0_13, %c0_14] : memref<16x32xbf16, #tpu.memory_space<vmem>>, vector<16x32xbf16>
      tpu.vector_store %arg6[%c0_13, %c0_14], %23 {strides = array<i32>} : memref<16x32xbf16, #tpu.memory_space<vmem>>, vector<16x32xbf16>,
    } else {
    }
    %c0 = arith.constant 0 : index
    %c0_1 = arith.constant 0 : index
    %3 = vector.load %arg6[%c0, %c0_1] : memref<16x32xbf16, #tpu.memory_space<vmem>>, vector<16x32xbf16>
    %c0_2 = arith.constant 0 : index
    %c0_3 = arith.constant 0 : index
    %4 = vector.load %arg4[%c0_2, %c0_3] : memref<32x96xbf16, #tpu.memory_space<vmem>>, vector<32x96xbf16>
    %cst = arith.constant dense<0.000000e+00> : vector<16x96xf32>
    %5 = tpu.matmul %3, %4, %cst {dimension_numbers = #tpu.dot_dimension_numbers<[1], [0], [0], [1], [0, 0, 1, 1], [], []>} : vector<16x32xbf16>, vector<32x96xbf16>, vector<16x96xf32> -> vector<16x96xf32>
    %6 = arith.truncf %5 : vector<16x96xf32> to vector<16x96xbf16>
    %c0_4 = arith.constant 0 : index
    %c0_5 = arith.constant 0 : index
    %7 = vector.load %arg5[%c0_4, %c0_5] : memref<16x96xbf16, #tpu.memory_space<vmem>>, vector<16x96xbf16>
    tpu.vector_store %arg5[%c0_4, %c0_5], %6 {strides = array<i32>} : memref<16x96xbf16, #tpu.memory_space<vmem>>, vector<16x96xbf16>,
    return
  }
  func.func @transform_0(%arg0: i32, %arg1: i32) -> (i32, i32) {
    %c0_i32 = arith.constant 0 : i32
    %c0_i32_0 = arith.constant 0 : i32
    return %arg0, %c0_i32 : i32, i32
  }
  func.func @transform_1(%arg0: i32, %arg1: i32) -> (i32, i32) {
    %c0_i32 = arith.constant 0 : i32
    %c0_i32_0 = arith.constant 0 : i32
    %c0_i32_1 = arith.constant 0 : i32
    return %c0_i32, %c0_i32_0 : i32, i32
  }
  func.func @transform_2(%arg0: i32, %arg1: i32) -> (i32, i32) {
    %c0_i32 = arith.constant 0 : i32
    %c0_i32_0 = arith.constant 0 : i32
    return %c0_i32, %arg1 : i32, i32
  }
  func.func @transform_3(%arg0: i32, %arg1: i32) -> (i32, i32) {
    %c0_i32 = arith.constant 0 : i32
    return %arg0, %arg1 : i32, i32
  }
}

module attributes {stable_mosaic.version = 11 : i64} {
  func.func @_attention_kernel(%arg0: i32, %arg1: memref<1x8x32xbf16, #tpu.memory_space<vmem>>, %arg2: memref<1x8x96xbf16, #tpu.memory_space<vmem>>, %arg3: memref<1x4x8xf32, #tpu.memory_space<vmem>>, %arg4: memref<1x1x8xf32, #tpu.memory_space<vmem>>, %arg5: memref<32x32xbf16, #tpu.memory_space<vmem>>, %arg6: memref<1x8x32xbf16, #tpu.memory_space<vmem>>) attributes {dimension_semantics = [#tpu.dimension_semantics<parallel>], iteration_bounds = array<i64: 2>, scalar_prefetch = 0 : i64, scratch_operands = 0 : i64, tpu.core_type = #tpu.core_type<tc>, window_params = [{transform_indices = @transform_0, window_bounds = array<i64: 1, 8, 32>}, {transform_indices = @transform_1, window_bounds = array<i64: 1, 8, 96>}, {transform_indices = @transform_2, window_bounds = array<i64: 1, 4, 8>}, {transform_indices = @transform_3, window_bounds = array<i64: 1, 1, 8>}, {pipeline_mode = #tpu.pipeline_mode<synchronous>, transform_indices = @transform_4, window_bounds = array<i64: 32, 32>}, {transform_indices = @transform_5, window_bounds = array<i64: 1, 8, 32>}]} {
    %c0 = arith.constant 0 : index
    %c0_0 = arith.constant 0 : index
    %c0_1 = arith.constant 0 : index
    %0 = vector.load %arg2[%c0, %c0_0, %c0_1] : memref<1x8x96xbf16, #tpu.memory_space<vmem>>, vector<1x8x96xbf16>
    %1 = vector.shape_cast %0 : vector<1x8x96xbf16> to vector<8x96xbf16>
    %2 = vector.extract_strided_slice %1 {offsets = [0, 0], sizes = [8, 32], strides = [1, 1]} : vector<8x96xbf16> to vector<8x32xbf16>
    %3 = vector.shape_cast %2 : vector<8x32xbf16> to vector<8x4x8xbf16>
    %4 = tpu.transpose %3, [1, 0, 2] : vector<8x4x8xbf16> -> vector<4x8x8xbf16>
    %5 = vector.extract_strided_slice %1 {offsets = [0, 32], sizes = [8, 32], strides = [1, 1]} : vector<8x96xbf16> to vector<8x32xbf16>
    %6 = vector.shape_cast %5 : vector<8x32xbf16> to vector<8x4x8xbf16>
    %7 = tpu.transpose %6, [1, 0, 2] : vector<8x4x8xbf16> -> vector<4x8x8xbf16>
    %8 = vector.extract_strided_slice %1 {offsets = [0, 64], sizes = [8, 32], strides = [1, 1]} : vector<8x96xbf16> to vector<8x32xbf16>
    %9 = vector.shape_cast %8 : vector<8x32xbf16> to vector<8x4x8xbf16>
    %10 = tpu.transpose %9, [1, 0, 2] : vector<8x4x8xbf16> -> vector<4x8x8xbf16>
    %c0_2 = arith.constant 0 : index
    %c0_3 = arith.constant 0 : index
    %c0_4 = arith.constant 0 : index
    %11 = vector.load %arg3[%c0_2, %c0_3, %c0_4] : memref<1x4x8xf32, #tpu.memory_space<vmem>>, vector<1x4x8xf32>
    %12 = vector.shape_cast %11 : vector<1x4x8xf32> to vector<4x8xf32>
    %c0_5 = arith.constant 0 : index
    %c0_6 = arith.constant 0 : index
    %c0_7 = arith.constant 0 : index
    %13 = vector.load %arg4[%c0_5, %c0_6, %c0_7] : memref<1x1x8xf32, #tpu.memory_space<vmem>>, vector<1x1x8xf32>
    %14 = vector.shape_cast %13 : vector<1x1x8xf32> to vector<1x8xf32>
    %cst = arith.constant 1.000000e+00 : f32
    %15 = vector.broadcast %cst : f32 to vector<1x8xf32>
    %16 = arith.subf %15, %14 : vector<1x8xf32>
    %cst_8 = arith.constant -1.000000e+09 : f32
    %17 = vector.broadcast %cst_8 : f32 to vector<1x8xf32>
    %18 = arith.mulf %16, %17 : vector<1x8xf32>
    %19 = tpu.iota {dimensions = array<i32: 0>} : vector<8x8xi32>
    %20 = tpu.iota {dimensions = array<i32: 1>} : vector<8x8xi32>
    %21 = arith.cmpi sle, %20, %19 : vector<8x8xi32>
    %cst_9 = arith.constant 0.000000e+00 : f32
    %cst_10 = arith.constant -1.000000e+09 : f32
    %22 = vector.broadcast %cst_9 : f32 to vector<8x8xf32>
    %23 = vector.broadcast %cst_10 : f32 to vector<8x8xf32>
    %24 = arith.select %21, %22, %23 : vector<8x8xi1>, vector<8x8xf32>
    %25 = vector.broadcast %18 : vector<1x8xf32> to vector<8x8xf32>
    %26 = arith.addf %24, %25 : vector<8x8xf32>
    "tpu.trace_start"() <{level = 10 : i32, message = "hqd,hkd->hqk"}> : () -> ()
    %cst_11 = arith.constant dense<0.000000e+00> : vector<4x8x8xf32>
    %27 = tpu.matmul %4, %7, %cst_11 {dimension_numbers = #tpu.dot_dimension_numbers<[2], [2], [1], [1], [0, 0, 0, 1, 1, 1], [0], [0]>} : vector<4x8x8xbf16>, vector<4x8x8xbf16>, vector<4x8x8xf32> -> vector<4x8x8xf32>
    "tpu.trace_stop"() : () -> ()
    %28 = vector.shape_cast %12 : vector<4x8xf32> to vector<4x1x8xf32>
    %29 = vector.broadcast %28 : vector<4x1x8xf32> to vector<4x8x8xf32>
    %30 = arith.addf %27, %29 : vector<4x8x8xf32>
    %31 = vector.shape_cast %26 : vector<8x8xf32> to vector<1x8x8xf32>
    %32 = vector.broadcast %31 : vector<1x8x8xf32> to vector<4x8x8xf32>
    %33 = arith.addf %30, %32 : vector<4x8x8xf32>
    %cst_12 = arith.constant dense<0xFF800000> : vector<4x8xf32>
    %34 = vector.multi_reduction <maximumf>, %33, %cst_12 [2] : vector<4x8x8xf32> to vector<4x8xf32>
    %35 = vector.shape_cast %34 : vector<4x8xf32> to vector<4x8x1xf32>
    %36 = vector.broadcast %35 : vector<4x8x1xf32> to vector<4x8x8xf32>
    %37 = arith.subf %33, %36 : vector<4x8x8xf32>
    %38 = math.exp %37 : vector<4x8x8xf32>
    %cst_13 = arith.constant dense<0.000000e+00> : vector<4x8xf32>
    %39 = vector.multi_reduction <add>, %38, %cst_13 [2] : vector<4x8x8xf32> to vector<4x8xf32>
    %40 = vector.shape_cast %39 : vector<4x8xf32> to vector<4x8x1xf32>
    %41 = tpu.reciprocal %40 {approx = true} : vector<4x8x1xf32> -> vector<4x8x1xf32>
    %42 = vector.broadcast %41 : vector<4x8x1xf32> to vector<4x8x8xf32>
    %43 = arith.mulf %38, %42 : vector<4x8x8xf32>
    %44 = arith.truncf %43 : vector<4x8x8xf32> to vector<4x8x8xbf16>
    "tpu.trace_start"() <{level = 10 : i32, message = "hqk,hkd->hqd"}> : () -> ()
    %cst_14 = arith.constant dense<0.000000e+00> : vector<4x8x8xf32>
    %45 = tpu.matmul %44, %10, %cst_14 {dimension_numbers = #tpu.dot_dimension_numbers<[2], [1], [1], [2], [0, 0, 0, 1, 1, 2], [0], [0]>} : vector<4x8x8xbf16>, vector<4x8x8xbf16>, vector<4x8x8xf32> -> vector<4x8x8xf32>
    "tpu.trace_stop"() : () -> ()
    %46 = tpu.transpose %45, [1, 0, 2] : vector<4x8x8xf32> -> vector<8x4x8xf32>
    %47 = vector.shape_cast %46 : vector<8x4x8xf32> to vector<8x32xf32>
    %48 = arith.truncf %47 : vector<8x32xf32> to vector<8x32xbf16>
    %c0_15 = arith.constant 0 : index
    %c0_16 = arith.constant 0 : index
    %49 = vector.load %arg5[%c0_15, %c0_16] : memref<32x32xbf16, #tpu.memory_space<vmem>>, vector<32x32xbf16>
    %cst_17 = arith.constant dense<0.000000e+00> : vector<8x32xf32>
    %50 = tpu.matmul %48, %49, %cst_17 {dimension_numbers = #tpu.dot_dimension_numbers<[1], [0], [0], [1], [0, 0, 1, 1], [], []>} : vector<8x32xbf16>, vector<32x32xbf16>, vector<8x32xf32> -> vector<8x32xf32>
    %c0_18 = arith.constant 0 : index
    %c0_19 = arith.constant 0 : index
    %c0_20 = arith.constant 0 : index
    %51 = vector.load %arg1[%c0_18, %c0_19, %c0_20] : memref<1x8x32xbf16, #tpu.memory_space<vmem>>, vector<1x8x32xbf16>
    %52 = vector.shape_cast %51 : vector<1x8x32xbf16> to vector<8x32xbf16>
    %53 = arith.extf %52 : vector<8x32xbf16> to vector<8x32xf32>
    %54 = arith.addf %53, %50 : vector<8x32xf32>
    %55 = arith.truncf %54 : vector<8x32xf32> to vector<8x32xbf16>
    %c0_21 = arith.constant 0 : index
    %c0_22 = arith.constant 0 : index
    %c0_23 = arith.constant 0 : index
    %56 = vector.load %arg6[%c0_21, %c0_22, %c0_23] : memref<1x8x32xbf16, #tpu.memory_space<vmem>>, vector<1x8x32xbf16>
    %57 = vector.shape_cast %56 : vector<1x8x32xbf16> to vector<8x32xbf16>
    %58 = vector.shape_cast %55 : vector<8x32xbf16> to vector<1x8x32xbf16>
    tpu.vector_store %arg6[%c0_21, %c0_22, %c0_23], %58 {strides = array<i32>} : memref<1x8x32xbf16, #tpu.memory_space<vmem>>, vector<1x8x32xbf16>,
    return
  }
  func.func @transform_0(%arg0: i32) -> (i32, i32, i32) {
    %c0_i32 = arith.constant 0 : i32
    %c0_i32_0 = arith.constant 0 : i32
    %c0_i32_1 = arith.constant 0 : i32
    return %arg0, %c0_i32, %c0_i32_0 : i32, i32, i32
  }
  func.func @transform_1(%arg0: i32) -> (i32, i32, i32) {
    %c0_i32 = arith.constant 0 : i32
    %c0_i32_0 = arith.constant 0 : i32
    %c0_i32_1 = arith.constant 0 : i32
    return %arg0, %c0_i32, %c0_i32_0 : i32, i32, i32
  }
  func.func @transform_2(%arg0: i32) -> (i32, i32, i32) {
    %c0_i32 = arith.constant 0 : i32
    %c0_i32_0 = arith.constant 0 : i32
    %c0_i32_1 = arith.constant 0 : i32
    return %arg0, %c0_i32, %c0_i32_0 : i32, i32, i32
  }
  func.func @transform_3(%arg0: i32) -> (i32, i32, i32) {
    %c0_i32 = arith.constant 0 : i32
    %c0_i32_0 = arith.constant 0 : i32
    %c0_i32_1 = arith.constant 0 : i32
    return %arg0, %c0_i32, %c0_i32_0 : i32, i32, i32
  }
  func.func @transform_4(%arg0: i32) -> (i32, i32) {
    %c0_i32 = arith.constant 0 : i32
    %c0_i32_0 = arith.constant 0 : i32
    %c0_i32_1 = arith.constant 0 : i32
    return %c0_i32, %c0_i32_0 : i32, i32
  }
  func.func @transform_5(%arg0: i32) -> (i32, i32, i32) {
    %c0_i32 = arith.constant 0 : i32
    %c0_i32_0 = arith.constant 0 : i32
    %c0_i32_1 = arith.constant 0 : i32
    return %arg0, %c0_i32, %c0_i32_0 : i32, i32, i32
  }
}

module attributes {stable_mosaic.version = 11 : i64} {
  func.func @_rms_ffn_kernel(%arg0: i32, %arg1: memref<16x32xbf16, #tpu.memory_space<vmem>>, %arg2: memref<1x32xf32, #tpu.memory_space<vmem>>, %arg3: memref<32x128xbf16, #tpu.memory_space<vmem>>, %arg4: memref<128x32xbf16, #tpu.memory_space<vmem>>, %arg5: memref<16x32xbf16, #tpu.memory_space<vmem>>) attributes {dimension_semantics = [#tpu.dimension_semantics<parallel>], iteration_bounds = array<i64: 1>, scalar_prefetch = 0 : i64, scratch_operands = 0 : i64, tpu.core_type = #tpu.core_type<tc>, window_params = [{transform_indices = @transform_0, window_bounds = array<i64: 16, 32>}, {pipeline_mode = #tpu.pipeline_mode<synchronous>, transform_indices = @transform_1, window_bounds = array<i64: 1, 32>}, {pipeline_mode = #tpu.pipeline_mode<synchronous>, transform_indices = @transform_2, window_bounds = array<i64: 32, 128>}, {pipeline_mode = #tpu.pipeline_mode<synchronous>, transform_indices = @transform_3, window_bounds = array<i64: 128, 32>}, {transform_indices = @transform_4, window_bounds = array<i64: 16, 32>}]} {
    %c0 = arith.constant 0 : index
    %c0_0 = arith.constant 0 : index
    %0 = vector.load %arg1[%c0, %c0_0] : memref<16x32xbf16, #tpu.memory_space<vmem>>, vector<16x32xbf16>
    %1 = arith.extf %0 : vector<16x32xbf16> to vector<16x32xf32>
    %2 = arith.mulf %1, %1 : vector<16x32xf32>
    %cst = arith.constant dense<0.000000e+00> : vector<16xf32>
    %3 = vector.multi_reduction <add>, %2, %cst [1] : vector<16x32xf32> to vector<16xf32>
    %4 = vector.shape_cast %3 : vector<16xf32> to vector<16x1xf32>
    %cst_1 = arith.constant 3.200000e+01 : f32
    %5 = vector.broadcast %cst_1 : f32 to vector<16x1xf32>
    %6 = arith.divf %4, %5 : vector<16x1xf32>
    %cst_2 = arith.constant 9.99999974E-6 : f32
    %7 = vector.broadcast %cst_2 : f32 to vector<16x1xf32>
    %8 = arith.addf %6, %7 : vector<16x1xf32>
    %9 = math.rsqrt %8 : vector<16x1xf32>
    %10 = vector.broadcast %9 : vector<16x1xf32> to vector<16x32xf32>
    %11 = arith.mulf %1, %10 : vector<16x32xf32>
    %c0_3 = arith.constant 0 : index
    %c0_4 = arith.constant 0 : index
    %12 = vector.load %arg2[%c0_3, %c0_4] : memref<1x32xf32, #tpu.memory_space<vmem>>, vector<1x32xf32>
    %13 = vector.broadcast %12 : vector<1x32xf32> to vector<16x32xf32>
    %14 = arith.mulf %11, %13 : vector<16x32xf32>
    %15 = arith.truncf %14 : vector<16x32xf32> to vector<16x32xbf16>
    %c0_5 = arith.constant 0 : index
    %c0_6 = arith.constant 0 : index
    %16 = vector.load %arg3[%c0_5, %c0_6] : memref<32x128xbf16, #tpu.memory_space<vmem>>, vector<32x128xbf16>
    %cst_7 = arith.constant dense<0.000000e+00> : vector<16x128xf32>
    %17 = tpu.matmul %15, %16, %cst_7 {dimension_numbers = #tpu.dot_dimension_numbers<[1], [0], [0], [1], [0, 0, 1, 1], [], []>} : vector<16x32xbf16>, vector<32x128xbf16>, vector<16x128xf32> -> vector<16x128xf32>
    %18 = arith.mulf %17, %17 : vector<16x128xf32>
    %19 = arith.mulf %17, %18 : vector<16x128xf32>
    %cst_8 = arith.constant 4.471500e-02 : f32
    %20 = vector.broadcast %cst_8 : f32 to vector<16x128xf32>
    %21 = arith.mulf %20, %19 : vector<16x128xf32>
    %22 = arith.addf %17, %21 : vector<16x128xf32>
    %cst_9 = arith.constant 0.797884583 : f32
    %23 = vector.broadcast %cst_9 : f32 to vector<16x128xf32>
    %24 = arith.mulf %23, %22 : vector<16x128xf32>
    %25 = math.tanh %24 : vector<16x128xf32>
    %cst_10 = arith.constant 1.000000e+00 : f32
    %26 = vector.broadcast %cst_10 : f32 to vector<16x128xf32>
    %27 = arith.addf %26, %25 : vector<16x128xf32>
    %cst_11 = arith.constant 5.000000e-01 : f32
    %28 = vector.broadcast %cst_11 : f32 to vector<16x128xf32>
    %29 = arith.mulf %28, %27 : vector<16x128xf32>
    %30 = arith.mulf %17, %29 : vector<16x128xf32>
    %31 = arith.truncf %30 : vector<16x128xf32> to vector<16x128xbf16>
    %c0_12 = arith.constant 0 : index
    %c0_13 = arith.constant 0 : index
    %32 = vector.load %arg4[%c0_12, %c0_13] : memref<128x32xbf16, #tpu.memory_space<vmem>>, vector<128x32xbf16>
    %cst_14 = arith.constant dense<0.000000e+00> : vector<16x32xf32>
    %33 = tpu.matmul %31, %32, %cst_14 {dimension_numbers = #tpu.dot_dimension_numbers<[1], [0], [0], [1], [0, 0, 1, 1], [], []>} : vector<16x128xbf16>, vector<128x32xbf16>, vector<16x32xf32> -> vector<16x32xf32>
    %34 = arith.addf %1, %33 : vector<16x32xf32>
    %35 = arith.truncf %34 : vector<16x32xf32> to vector<16x32xbf16>
    %c0_15 = arith.constant 0 : index
    %c0_16 = arith.constant 0 : index
    %36 = vector.load %arg5[%c0_15, %c0_16] : memref<16x32xbf16, #tpu.memory_space<vmem>>, vector<16x32xbf16>
    tpu.vector_store %arg5[%c0_15, %c0_16], %35 {strides = array<i32>} : memref<16x32xbf16, #tpu.memory_space<vmem>>, vector<16x32xbf16>,
    return
  }
  func.func @transform_0(%arg0: i32) -> (i32, i32) {
    %c0_i32 = arith.constant 0 : i32
    %c0_i32_0 = arith.constant 0 : i32
    return %arg0, %c0_i32 : i32, i32
  }
  func.func @transform_1(%arg0: i32) -> (i32, i32) {
    %c0_i32 = arith.constant 0 : i32
    %c0_i32_0 = arith.constant 0 : i32
    %c0_i32_1 = arith.constant 0 : i32
    return %c0_i32, %c0_i32_0 : i32, i32
  }
  func.func @transform_2(%arg0: i32) -> (i32, i32) {
    %c0_i32 = arith.constant 0 : i32
    %c0_i32_0 = arith.constant 0 : i32
    %c0_i32_1 = arith.constant 0 : i32
    return %c0_i32, %c0_i32_0 : i32, i32
  }
  func.func @transform_3(%arg0: i32) -> (i32, i32) {
    %c0_i32 = arith.constant 0 : i32
    %c0_i32_0 = arith.constant 0 : i32
    %c0_i32_1 = arith.constant 0 : i32
    return %c0_i32, %c0_i32_0 : i32, i32
  }
  func.func @transform_4(%arg0: i32) -> (i32, i32) {
    %c0_i32 = arith.constant 0 : i32
    %c0_i32_0 = arith.constant 0 : i32
    return %arg0, %c0_i32 : i32, i32
  }
}

module attributes {stable_mosaic.version = 11 : i64} {
  func.func @_rms_matmul_kernel(%arg0: i32, %arg1: i32, %arg2: memref<16x32xbf16, #tpu.memory_space<vmem>>, %arg3: memref<1x32xf32, #tpu.memory_space<vmem>>, %arg4: memref<32x64xbf16, #tpu.memory_space<vmem>>, %arg5: memref<16x64xf32, #tpu.memory_space<vmem>>, %arg6: memref<16x32xbf16, #tpu.memory_space<vmem>>) attributes {dimension_semantics = [#tpu.dimension_semantics<parallel>, #tpu.dimension_semantics<arbitrary>], iteration_bounds = array<i64: 1, 1>, scalar_prefetch = 0 : i64, scratch_operands = 1 : i64, tpu.core_type = #tpu.core_type<tc>, window_params = [{transform_indices = @transform_0, window_bounds = array<i64: 16, 32>}, {pipeline_mode = #tpu.pipeline_mode<synchronous>, transform_indices = @transform_1, window_bounds = array<i64: 1, 32>}, {transform_indices = @transform_2, window_bounds = array<i64: 32, 64>}, {transform_indices = @transform_3, window_bounds = array<i64: 16, 64>}]} {
    %c0_i32 = arith.constant 0 : i32
    %0 = arith.cmpi eq, %arg1, %c0_i32 : i32
    %1 = arith.extui %0 : i1 to i32
    %c0_i32_0 = arith.constant 0 : i32
    %2 = arith.cmpi ne, %1, %c0_i32_0 : i32
    scf.if %2 {
      %c0_6 = arith.constant 0 : index
      %c0_7 = arith.constant 0 : index
      %7 = vector.load %arg2[%c0_6, %c0_7] : memref<16x32xbf16, #tpu.memory_space<vmem>>, vector<16x32xbf16>
      %8 = arith.extf %7 : vector<16x32xbf16> to vector<16x32xf32>
      %9 = arith.mulf %8, %8 : vector<16x32xf32>
      %cst_8 = arith.constant dense<0.000000e+00> : vector<16xf32>
      %10 = vector.multi_reduction <add>, %9, %cst_8 [1] : vector<16x32xf32> to vector<16xf32>
      %11 = vector.shape_cast %10 : vector<16xf32> to vector<16x1xf32>
      %cst_9 = arith.constant 3.200000e+01 : f32
      %12 = vector.broadcast %cst_9 : f32 to vector<16x1xf32>
      %13 = arith.divf %11, %12 : vector<16x1xf32>
      %cst_10 = arith.constant 9.99999974E-6 : f32
      %14 = vector.broadcast %cst_10 : f32 to vector<16x1xf32>
      %15 = arith.addf %13, %14 : vector<16x1xf32>
      %16 = math.rsqrt %15 : vector<16x1xf32>
      %17 = vector.broadcast %16 : vector<16x1xf32> to vector<16x32xf32>
      %18 = arith.mulf %8, %17 : vector<16x32xf32>
      %c0_11 = arith.constant 0 : index
      %c0_12 = arith.constant 0 : index
      %19 = vector.load %arg3[%c0_11, %c0_12] : memref<1x32xf32, #tpu.memory_space<vmem>>, vector<1x32xf32>
      %20 = vector.broadcast %19 : vector<1x32xf32> to vector<16x32xf32>
      %21 = arith.mulf %18, %20 : vector<16x32xf32>
      %22 = arith.truncf %21 : vector<16x32xf32> to vector<16x32xbf16>
      %c0_13 = arith.constant 0 : index
      %c0_14 = arith.constant 0 : index
      %23 = vector.load %arg6[%c0_13, %c0_14] : memref<16x32xbf16, #tpu.memory_space<vmem>>, vector<16x32xbf16>
      tpu.vector_store %arg6[%c0_13, %c0_14], %22 {strides = array<i32>} : memref<16x32xbf16, #tpu.memory_space<vmem>>, vector<16x32xbf16>,
    } else {
    }
    %c0 = arith.constant 0 : index
    %c0_1 = arith.constant 0 : index
    %3 = vector.load %arg6[%c0, %c0_1] : memref<16x32xbf16, #tpu.memory_space<vmem>>, vector<16x32xbf16>
    %c0_2 = arith.constant 0 : index
    %c0_3 = arith.constant 0 : index
    %4 = vector.load %arg4[%c0_2, %c0_3] : memref<32x64xbf16, #tpu.memory_space<vmem>>, vector<32x64xbf16>
    %cst = arith.constant dense<0.000000e+00> : vector<16x64xf32>
    %5 = tpu.matmul %3, %4, %cst {dimension_numbers = #tpu.dot_dimension_numbers<[1], [0], [0], [1], [0, 0, 1, 1], [], []>} : vector<16x32xbf16>, vector<32x64xbf16>, vector<16x64xf32> -> vector<16x64xf32>
    %c0_4 = arith.constant 0 : index
    %c0_5 = arith.constant 0 : index
    %6 = vector.load %arg5[%c0_4, %c0_5] : memref<16x64xf32, #tpu.memory_space<vmem>>, vector<16x64xf32>
    tpu.vector_store %arg5[%c0_4, %c0_5], %5 {strides = array<i32>} : memref<16x64xf32, #tpu.memory_space<vmem>>, vector<16x64xf32>,
    return
  }
  func.func @transform_0(%arg0: i32, %arg1: i32) -> (i32, i32) {
    %c0_i32 = arith.constant 0 : i32
    %c0_i32_0 = arith.constant 0 : i32
    return %arg0, %c0_i32 : i32, i32
  }
  func.func @transform_1(%arg0: i32, %arg1: i32) -> (i32, i32) {
    %c0_i32 = arith.constant 0 : i32
    %c0_i32_0 = arith.constant 0 : i32
    %c0_i32_1 = arith.constant 0 : i32
    return %c0_i32, %c0_i32_0 : i32, i32
  }
  func.func @transform_2(%arg0: i32, %arg1: i32) -> (i32, i32) {
    %c0_i32 = arith.constant 0 : i32
    %c0_i32_0 = arith.constant 0 : i32
    return %c0_i32, %arg1 : i32, i32
  }
  func.func @transform_3(%arg0: i32, %arg1: i32) -> (i32, i32) {
    %c0_i32 = arith.constant 0 : i32
    return %arg0, %arg1 : i32, i32
  }
}

</mosaic_0001>

<bundles_post_ra>
// kernel: llmp_forward.8
= control target key start
LH: loop header
LB: loop body
LE: loop exit
PB: predicated region body
PF: predicated region fallthrough
CT: control target
= control target key end

     0   :  { %vm15_vm0 = vcmask 261120   ;;  %vm48_vm1 = vcmask 257024   ;;  %s94_s0 = inlined_call_operand.vmem [shape: f32[16,32], index: 0, kind: input, shape index: {}]   ;;  %s95_s1 = inlined_call_operand.vmem [shape: f32[1,32], index: 1, kind: input, shape index: {}]   ;;  %s96_s2 = inlined_call_operand.vmem [shape: bf16[16,32], index: 2, kind: output, shape index: {}]  }
   0x1   :  { %v11_v0 = vld [vmem:[%s94_s0] sm:$0xff]  ;;  %v12_v1 = vld [vmem:[%s94_s0 + $0x8] sm:$0xff] }
   0x2   :  { %v13_v2 = vmul.f32 %v11_v0, %v11_v0  ;;  %v14_v3 = vmul.f32 %v12_v1, %v12_v1  ;;  %v55_v13 = vld [vmem:[%s95_s1] ss:$0 sm:$0xff] }
   0x4   :  { %v16_v4 = vsel %vm15_vm0, %v13_v2, 0.0  ;;  %v19_v5 = vsel %vm15_vm0, %v14_v3, 0.0 }
   0x5   :  { %17 = vadd.xlane.f32.xlu0 %v16_v4 }
   0x9   :  { %20 = vadd.xlane.f32.xlu0 %v19_v5 }
  0x92   :  { %v18_v6 = vpop.xlane.xlu0 %17 }
  0x93   :  { %v23_v7 = vmul.f32 0.03125, %v18_v6 }
  0x95   :  { %v25_v8 = vadd.f32 1e-05, %v23_v7 }
  0x96   :  { %v21_v9 = vpop.xlane.xlu0 %20 }
  0x97   :  { %60 = vrsqrt.f32 %v25_v8  ;;  %v24_v10 = vmul.f32 0.03125, %v21_v9 }
  0x99   :  { %v26_v11 = vadd.f32 1e-05, %v24_v10 }
  0x9b   :  { %62 = vrsqrt.f32 %v26_v11 }
  0xa1   :  { %v61_v12 = vpop.eup %60 }
  0xa2   :  { %v29_v14 = vmul.f32 %v61_v12, %v11_v0 }
  0xa4   :  { %v38_v15 = vmul.f32 %v55_v13, %v29_v14 }
  0xa5   :  { %v63_v16 = vpop.eup %62 }
  0xa6   :  { %v58_v17 = vpack.c.bf16 %v38_v15, %v38_v15  ;;  %v30_v18 = vmul.f32 %v63_v16, %v12_v1 }
  0xa8   :  { %49 = vst.msk [vmem:[%s96_s2] sm:$0xf] %vm48_vm1, %v58_v17  ;;  %v39_v19 = vmul.f32 %v55_v13, %v30_v18 }
  0xaa   :  { %v59_v20 = vpack.c.bf16 %v39_v19, %v39_v19 }
  0xac   :  { %50 = vst.msk [vmem:[%s96_s2 + $0x4] sm:$0xf] %vm48_vm1, %v59_v20 }

// kernel: llmp_forward.9
= control target key start
LH: loop header
LB: loop body
LE: loop exit
PB: predicated region body
PF: predicated region fallthrough
CT: control target
= control target key end

     0   :  { %vm25_vm0 = vcmask 261120   ;;  %v160_v8 = vmov 0.0   ;;  %vm161_vm1 = vmmov 0   ;;  %vm122_vm2 = vcmask 781312   ;;  %s204_s0 = inlined_call_operand.vmem [shape: bf16[16,32], index: 0, kind: input, shape index: {}]   ;;  %s205_s2 = inlined_call_operand.vmem [shape: bf16[32,96], index: 2, kind: input, shape index: {}]   ;;  %s206_s1 = inlined_call_operand.vmem [shape: f32[1,32], index: 1, kind: input, shape index: {}]   ;;  %s207_s3 = inlined_call_operand.vmem [shape: bf16[16,96], index: 3, kind: output, shape index: {}]  }
   0x1   :  { %v138_v0 = vld [vmem:[%s204_s0] sm:$0xff]   ;;  %144 = vmatprep.subr.bf16.mxu0 %v160_v8  ;;  %v155_v9 = vld [vmem:[%s205_s2 + $0x8] sm:$0xff]   ;;  %148 = vmatprep.mubr.msk.bf16.mxu0 %vm161_vm1, %v160_v8 }
   0x2   :  { %v139_v1 = vunpack.c.l.bf16 %v138_v0  ;;  %v140_v2 = vunpack.c.h.bf16 %v138_v0  ;;  %v154_v7 = vld [vmem:[%s205_s2] sm:$0xff]  }
   0x3   :  { %145 = vmatpush3.bf16.msra.mxu0 %v154_v7  ;;  %v129_v19 = vld [vmem:[%s206_s1] ss:$0 sm:$0xff] }
   0x4   :  { %v23_v3 = vmul.f32 %v139_v1, %v139_v1  ;;  %v24_v4 = vmul.f32 %v140_v2, %v140_v2  ;;  %146 = vmatprep.subr.bf16.mxu0 %v160_v8 }
   0x6   :  { %v26_v5 = vsel %vm25_vm0, %v23_v3, 0.0  ;;  %v29_v6 = vsel %vm25_vm0, %v24_v4, 0.0 }
   0x7   :  { %27 = vadd.xlane.f32.xlu0 %v26_v5  ;;  %147 = vmatpush3.bf16.msra.mxu0 %v155_v9 }
   0xb   :  { %30 = vadd.xlane.f32.xlu0 %v29_v6 }
  0x94   :  { %v28_v10 = vpop.xlane.xlu0 %27 }
  0x95   :  { %v33_v11 = vmul.f32 0.03125, %v28_v10 }
  0x97   :  { %v35_v12 = vadd.f32 1e-05, %v33_v11 }
  0x98   :  { %v31_v13 = vpop.xlane.xlu0 %30 }
  0x99   :  { %156 = vrsqrt.f32 %v35_v12  ;;  %v34_v14 = vmul.f32 0.03125, %v31_v13 }
  0x9b   :  { %v36_v15 = vadd.f32 1e-05, %v34_v14 }
  0x9d   :  { %158 = vrsqrt.f32 %v36_v15 }
  0xa3   :  { %v157_v16 = vpop.eup %156 }
  0xa4   :  { %v39_v17 = vmul.f32 %v157_v16, %v139_v1 }
  0xa6   :  { %v48_v21 = vmul.f32 %v129_v19, %v39_v17 }
  0xa7   :  { %v159_v18 = vpop.eup %158 }
  0xa8   :  { %v40_v20 = vmul.f32 %v159_v18, %v140_v2 }
  0xaa   :  { %v49_v22 = vmul.f32 %v129_v19, %v40_v20 }
  0xac   :  { %v50_v23 = vpack.c.bf16 %v49_v22, %v48_v21 }
  0xae   :  { %51 = vst.msk [vmem:[#allocation2] sm:$0xff] %vm25_vm0, %v50_v23 }
  0xb5   :  { %v52_v24 = vld [vmem:[#allocation2] sm:$0xff] }
  0xb6   :  { %149 = vmatmul.mubr.msk.bf16.vlgmr.msra.gmra.mrb[0].mxu0 %vm25_vm0, %v52_v24 }
 0x189   :  { %v107_v25 = vpop.f32.mrb[0].mxu0 }
 0x18a   :  { %v135_v26 = vpack.c.bf16 %v107_v25, %v107_v25  ;;  %v150_v27 = vpop.f32.mrb[1].mxu0 }
 0x18b   :  { %v110_v28 = vpop.f32.mrb[2].mxu0 }
 0x18c   :  { %123 = vst.msk [vmem:[%s207_s3] sm:$0xf] %vm122_vm2, %v135_v26  ;;  %v136_v29 = vpack.c.bf16 %v110_v28, %v110_v28  ;;  %v151_v30 = vpop.f32.mrb[3].mxu0 }
 0x18e   :  { %124 = vst.msk [vmem:[%s207_s3 + $0x4] sm:$0xf] %vm122_vm2, %v136_v29 }

// kernel: llmp_forward.11
= control target key start
LH: loop header
LB: loop body
LE: loop exit
PB: predicated region body
PF: predicated region fallthrough
CT: control target
= control target key end

     0   :  { %vm24_vm0 = vcmask 261120   ;;  %v331_v7 = vmov 0.0   ;;  %vm332_vm1 = vmmov 0   ;;  %vm244_vm2 = vcmask 257024   ;;  %s415_s0 = inlined_call_operand.vmem [shape: bf16[16,32], index: 0, kind: input, shape index: {}]   ;;  %s416_s2 = inlined_call_operand.vmem [shape: bf16[32,128], index: 2, kind: input, shape index: {}]   ;;  %s417_s1 = inlined_call_operand.vmem [shape: f32[1,32], index: 1, kind: input, shape index: {}]   ;;  %s418_s3 = inlined_call_operand.vmem [shape: bf16[128,32], index: 3, kind: input, shape index: {}]   ;;  %s419_s4 = inlined_call_operand.vmem [shape: bf16[16,32], index: 4, kind: output, shape index: {}]  }
   0x1   :  { %v268_v0 = vld [vmem:[%s415_s0] sm:$0xff]   ;;  %283 = vmatprep.subr.bf16.mxu0 %v331_v7  ;;  %287 = vmatprep.mubr.msk.bf16.mxu0 %vm332_vm1, %v331_v7  ;;  %v314_v9 = vld [vmem:[%s416_s2 + $0x8] sm:$0xff]   ;;  %v317_v26 = vld [vmem:[%s418_s3 + $0x10] sm:$0xff]  }
   0x2   :  { %v361_v1 = vunpack.c.l.bf16 %v268_v0  ;;  %v363_v2 = vunpack.c.h.bf16 %v268_v0  ;;  %v313_v8 = vld [vmem:[%s416_s2] sm:$0xff]   ;;  %291 = vmatprep.subr.bf16.mxu1 %v331_v7  ;;  %307 = vmatprep.mubr.msk.bf16.mxu1 %vm332_vm1, %v331_v7  ;;  %v316_v25 = vld [vmem:[%s418_s3 + $0x8] sm:$0xff]   ;;  %v318_v27 = vld [vmem:[%s418_s3 + $0x18] sm:$0xff]  }
   0x3   :  { %284 = vmatpush3.bf16.msra.mxu0 %v313_v8  ;;  %v251_v19 = vld [vmem:[%s417_s1] ss:$0 sm:$0xff]  ;;  %v320_v29 = vld [vmem:[%s418_s3 + $0x28] sm:$0xff]   ;;  %v321_v30 = vld [vmem:[%s418_s3 + $0x30] sm:$0xff]  }
   0x4   :  { %v22_v3 = vmul.f32 %v361_v1, %v361_v1  ;;  %v23_v4 = vmul.f32 %v363_v2, %v363_v2  ;;  %285 = vmatprep.subr.bf16.mxu0 %v331_v7  ;;  %v315_v24 = vld [vmem:[%s418_s3] sm:$0xff]   ;;  %v322_v31 = vld [vmem:[%s418_s3 + $0x38] sm:$0xff]  }
   0x5   :  { %292 = vmatpush3.bf16.msra.mxu1 %v315_v24  ;;  %v319_v28 = vld [vmem:[%s418_s3 + $0x20] sm:$0xff]  }
   0x6   :  { %v25_v5 = vsel %vm24_vm0, %v22_v3, 0.0  ;;  %v28_v6 = vsel %vm24_vm0, %v23_v4, 0.0  ;;  %293 = vmatprep.subr.bf16.mxu1 %v331_v7 }
   0x7   :  { %26 = vadd.xlane.f32.xlu0 %v25_v5  ;;  %286 = vmatpush3.bf16.msra.mxu0 %v314_v9 }
   0x9   :  { %294 = vmatpush3.bf16.msra.mxu1 %v316_v25 }
   0xa   :  { %295 = vmatprep.subr.bf16.mxu1 %v331_v7 }
   0xb   :  { %29 = vadd.xlane.f32.xlu0 %v28_v6 }
   0xd   :  { %296 = vmatpush3.bf16.msra.mxu1 %v317_v26 }
   0xe   :  { %297 = vmatprep.subr.bf16.mxu1 %v331_v7 }
  0x11   :  { %298 = vmatpush3.bf16.msra.mxu1 %v318_v27 }
  0x12   :  { %299 = vmatprep.subr.bf16.mxu1 %v331_v7 }
  0x15   :  { %300 = vmatpush3.bf16.msra.mxu1 %v319_v28 }
  0x16   :  { %301 = vmatprep.subr.bf16.mxu1 %v331_v7 }
  0x19   :  { %302 = vmatpush3.bf16.msra.mxu1 %v320_v29 }
  0x1a   :  { %303 = vmatprep.subr.bf16.mxu1 %v331_v7 }
  0x1d   :  { %304 = vmatpush3.bf16.msra.mxu1 %v321_v30 }
  0x1e   :  { %305 = vmatprep.subr.bf16.mxu1 %v331_v7 }
  0x21   :  { %306 = vmatpush3.bf16.msra.mxu1 %v322_v31 }
  0x94   :  { %v27_v10 = vpop.xlane.xlu0 %26 }
  0x95   :  { %v32_v11 = vmul.f32 0.03125, %v27_v10 }
  0x97   :  { %v34_v12 = vadd.f32 1e-05, %v32_v11 }
  0x98   :  { %v30_v13 = vpop.xlane.xlu0 %29 }
  0x99   :  { %323 = vrsqrt.f32 %v34_v12  ;;  %v33_v14 = vmul.f32 0.03125, %v30_v13 }
  0x9b   :  { %v35_v15 = vadd.f32 1e-05, %v33_v14 }
  0x9d   :  { %325 = vrsqrt.f32 %v35_v15 }
  0xa3   :  { %v324_v16 = vpop.eup %323 }
  0xa4   :  { %v38_v17 = vmul.f32 %v324_v16, %v361_v1 }
  0xa6   :  { %v47_v21 = vmul.f32 %v251_v19, %v38_v17 }
  0xa7   :  { %v326_v18 = vpop.eup %325 }
  0xa8   :  { %v39_v20 = vmul.f32 %v326_v18, %v363_v2 }
  0xaa   :  { %v48_v22 = vmul.f32 %v251_v19, %v39_v20 }
  0xac   :  { %v49_v23 = vpack.c.bf16 %v48_v22, %v47_v21 }
  0xae   :  { %288 = vmatmul.mubr.msk.bf16.vlgmr.msra.gmra.mrb[0].mxu0 %vm24_vm0, %v49_v23 }
 0x181   :  { %v103_v32 = vpop.f32.mrb[0].mxu0 }
 0x182   :  { %v110_v33 = vmul.f32 %v103_v32, %v103_v32  ;;  %v289_v34 = vpop.f32.mrb[1].mxu0 }
 0x183   :  { %v106_v35 = vpop.f32.mrb[2].mxu0 }
 0x184   :  { %v112_v36 = vmul.f32 %v110_v33, %v103_v32  ;;  %v111_v37 = vmul.f32 %v106_v35, %v106_v35  ;;  %v290_v38 = vpop.f32.mrb[3].mxu0 }
 0x186   :  { %v114_v39 = vmul.f32 0.044715, %v112_v36  ;;  %v113_v40 = vmul.f32 %v111_v37, %v106_v35 }
 0x188   :  { %v116_v41 = vadd.f32 %v114_v39, %v103_v32  ;;  %v115_v42 = vmul.f32 0.044715, %v113_v40 }
 0x18a   :  { %v118_v43 = vmul.f32 0.7978846, %v116_v41  ;;  %v117_v44 = vadd.f32 %v115_v42, %v106_v35 }
 0x18c   :  { %327 = vtanh.f32 %v118_v43  ;;  %v119_v45 = vmul.f32 0.7978846, %v117_v44 }
 0x18e   :  { %329 = vtanh.f32 %v119_v45 }
 0x196   :  { %v328_v46 = vpop.eup %327 }
 0x197   :  { %v122_v47 = vadd.f32 1.0, %v328_v46 }
 0x198   :  { %v330_v48 = vpop.eup %329 }
 0x199   :  { %v124_v49 = vmul.f32 0.5, %v122_v47  ;;  %v123_v50 = vadd.f32 1.0, %v330_v48 }
 0x19b   :  { %v125_v51 = vmul.f32 0.5, %v123_v50  ;;  %v126_v52 = vmul.f32 %v124_v49, %v103_v32 }
 0x19d   :  { %v127_v53 = vmul.f32 %v125_v51, %v106_v35 }
 0x19f   :  { %v128_v54 = vpack.c.bf16 %v127_v53, %v126_v52 }
 0x1a1   :  { %308 = vmatmul.mubr.bf16.vlgmr.msra.gmra.mrb[0].mxu1 %v128_v54 }
 0x274   :  { %v227_v55 = vpop.f32.mrb[0].mxu1 }
 0x275   :  { %v234_v56 = vadd.f32 %v361_v1, %v227_v55  ;;  %v309_v57 = vpop.f32.mrb[1].mxu1 }
 0x276   :  { %v230_v58 = vpop.f32.mrb[2].mxu1 }
 0x277   :  { %v265_v59 = vpack.c.bf16 %v234_v56, %v234_v56  ;;  %v235_v60 = vadd.f32 %v363_v2, %v230_v58  ;;  %v310_v61 = vpop.f32.mrb[3].mxu1 }
 0x279   :  { %245 = vst.msk [vmem:[%s419_s4] sm:$0xf] %vm244_vm2, %v265_v59  ;;  %v266_v62 = vpack.c.bf16 %v235_v60, %v235_v60 }
 0x27b   :  { %246 = vst.msk [vmem:[%s419_s4 + $0x4] sm:$0xf] %vm244_vm2, %v266_v62 }

// kernel: llmp_forward.15
= control target key start
LH: loop header
LB: loop body
LE: loop exit
PB: predicated region body
PF: predicated region fallthrough
CT: control target
= control target key end

     0   :  { %vm26_vm0 = vcmask 261120   ;;  %s241_s0 = inlined_call_operand.vmem [shape: bf16[16,32], index: 0, kind: input, shape index: {}]   ;;  %s242_s1 = inlined_call_operand.vmem [shape: f32[1,32], index: 1, kind: input, shape index: {}]   ;;  %s243_s2 = inlined_call_operand.vmem [shape: bf16[32,64], index: 2, kind: input, shape index: {}]   ;;  %s244_s3 = inlined_call_operand.hbm [shape: f32[16,64], index: 3, kind: output, shape index: {}]  }
   0x1   :  { %v139_v0 = vld [vmem:[%s241_s0] sm:$0xff]  }
   0x2   :  { %v140_v1 = vunpack.c.l.bf16 %v139_v0  ;;  %v141_v2 = vunpack.c.h.bf16 %v139_v0 }
   0x3   :  { %8 = vsyncpa [#allocation4], 0  ;;  %v158_v7 = vld [vmem:[%s243_s2] sm:$0xff]   ;;  %v188_v8 = vmov 0.0   ;;  %v159_v9 = vld [vmem:[%s243_s2 + $0x8] sm:$0xff]   ;;  %vm189_vm1 = vmmov 0  }
   0x4   :  { %v24_v3 = vmul.f32 %v140_v1, %v140_v1  ;;  %v25_v4 = vmul.f32 %v141_v2, %v141_v2  ;;  %145 = vmatprep.subr.bf16.mxu0 %v188_v8  ;;  %149 = vmatprep.mubr.msk.bf16.mxu0 %vm189_vm1, %v188_v8  ;;  %v134_v19 = vld [vmem:[%s242_s1] ss:$0 sm:$0xff]  ;;  %s190_s2 = smov [#allocation3]   ;;  %vm115_vm2 = vcmask 523264  }
   0x5   :  { %146 = vmatpush3.bf16.msra.mxu0 %v158_v7  ;;  %s123_s19 = sshll.u32 %s190_s2, 4  ;;  %s124_s19 = int_to_ptr.vmem [resolvable:$true] %s123_s19 }
   0x6   :  { %v27_v5 = vsel %vm26_vm0, %v24_v3, 0.0  ;;  %v30_v6 = vsel %vm26_vm0, %v25_v4, 0.0  ;;  %147 = vmatprep.subr.bf16.mxu0 %v188_v8  ;;  %s164_s1 = scalar_lea.vmem %s124_s19, 256  ;;  %p169_p1 = scmp.lt.s32.totalorder %s124_s19, %s124_s19 }
   0x7   :  { %28 = vadd.xlane.f32.xlu0 %v27_v5  ;;  %p165_p0 = scmp.ne.s32.totalorder %s124_s19, %s164_s1  ;;  %p170_p2 = scmp.lt.s32.totalorder %s164_s1, %s164_s1 }
   0x9   :  { %148 = vmatpush3.bf16.msra.mxu0 %v159_v9  ;;  %p171_p3 = por %p170_p2, %p169_p1 }
   0xb   :  { %31 = vadd.xlane.f32.xlu0 %v30_v6  ;;  %p172_p4 = pnand %p171_p3, %p165_p0 }
  0x94   :  { %v29_v10 = vpop.xlane.xlu0 %28 }
  0x95   :  { %v34_v11 = vmul.f32 0.03125, %v29_v10 }
  0x97   :  { %v36_v12 = vadd.f32 1e-05, %v34_v11 }
  0x98   :  { %v32_v13 = vpop.xlane.xlu0 %31 }
  0x99   :  { %160 = vrsqrt.f32 %v36_v12  ;;  %v35_v14 = vmul.f32 0.03125, %v32_v13 }
  0x9b   :  { %v37_v15 = vadd.f32 1e-05, %v35_v14 }
  0x9d   :  { %162 = vrsqrt.f32 %v37_v15 }
  0xa3   :  { %v161_v16 = vpop.eup %160 }
  0xa4   :  { %v40_v17 = vmul.f32 %v161_v16, %v140_v1 }
  0xa6   :  { %v49_v21 = vmul.f32 %v134_v19, %v40_v17 }
  0xa7   :  { %v163_v18 = vpop.eup %162 }
  0xa8   :  { %v41_v20 = vmul.f32 %v163_v18, %v141_v2 }
  0xaa   :  { %v50_v22 = vmul.f32 %v134_v19, %v41_v20 }
  0xac   :  { %v51_v23 = vpack.c.bf16 %v50_v22, %v49_v21 }
  0xae   :  { %52 = vst.msk [vmem:[#allocation2] sm:$0xff] %vm26_vm0, %v51_v23 }
  0xb5   :  { %v53_v24 = vld [vmem:[#allocation2] sm:$0xff] }
  0xb6   :  { %150 = vmatmul.mubr.msk.bf16.vlgmr.msra.gmra.mrb[0].mxu0 %vm26_vm0, %v53_v24 }
 0x189   :  { %v108_v25 = vpop.f32.mrb[0].mxu0 }
 0x18a   :  { %116 = vst.msk [vmem:[#allocation3] sm:$0xff] %vm115_vm2, %v108_v25  ;;  %v151_v26 = vpop.f32.mrb[1].mxu0 }
 0x18b   :  { %v111_v27 = vpop.f32.mrb[2].mxu0 }
 0x18c   :  { %117 = vst.msk [vmem:[#allocation3 + $0x8] sm:$0xff] %vm115_vm2, %v111_v27  ;;  %v152_v28 = vpop.f32.mrb[3].mxu0 }
 0x18d   :  { %175 = shalt.err (!%p172_p4)
}
 0x18e   :  { %s176_s22 = scalar_lea.hbm %s244_s3, 256 }
 0x18f   :  { %p177_p5 = scmp.ne.s32.totalorder %s244_s3, %s176_s22  ;;  %p180_p6 = scmp.lt.u32.totalorder %s176_s22, %s244_s3 }
 0x191   :  { %p182_p7 = pnand %p180_p6, %p177_p5 }
 0x193   :  { %185 = shalt.err (!%p182_p7)
}
 0x194   :  { %s191_s27 = smov 128   ;;  %s192_s28 = smov 8  }
 0x195   :  { %129 = dma.vmem_to_hbm [thread:$0]  %s124_s19, 256, %s244_s3, [#allocation4], %s191_s27, %s191_s27, %s192_s28  }
 0x196   :  { %186 = dma.done.wait [#allocation4], 256  }
 0x197   :  { %187 = vsyncadd [#allocation4], 4294967040 }
 0x198   :  { %133 = vsyncpa [#allocation4], 1 }

// kernel: llmp_forward.10
= control target key start
LH: loop header
LB: loop body
LE: loop exit
PB: predicated region body
PF: predicated region fallthrough
CT: control target
= control target key end

     0   :  { %s1709_s18 = smov 0   ;;  %s1924_s0 = inlined_call_operand.vmem [shape: bf16[2,8,32], index: 0, kind: input, shape index: {}]   ;;  %s1925_s1 = inlined_call_operand.vmem [shape: bf16[2,8,96], index: 1, kind: input, shape index: {}]   ;;  %s1926_s2 = inlined_call_operand.vmem [shape: f32[2,4,8], index: 2, kind: input, shape index: {}]   ;;  %s1927_s3 = inlined_call_operand.vmem [shape: f32[2,1,8], index: 3, kind: input, shape index: {}]   ;;  %s1928_s4 = inlined_call_operand.vmem [shape: bf16[32,32], index: 4, kind: input, shape index: {}]   ;;  %s1929_s5 = inlined_call_operand.vmem [shape: bf16[2,8,32], index: 5, kind: output, shape index: {}]  }
   0x1 LB: > { %s1509_s19 = sadd.s32 4294967295, %s1662_s18   ;;  %p1513_p0 = scmp.ge.s32.totalorder %s1662_s18, 1  ;;  %s1662_s18 = sphi %s1709_s18, %s15_s18  }
   0x2   : > { %p212_p1 = scmp.lt.s32.totalorder %s1662_s18, 3 }
   0x4   : > { %p213_p2 = pnand %p1513_p0, %p212_p1 }
   0x5   : > { %p249_p3 = scmp.lt.s32.totalorder (!%p213_p2), %s1509_s19, 1  ;;  %s1664_s24 = smov (!%p213_p2), 120   ;;  %v1668_v3 = vmov (!%p213_p2), 0.0   ;;  %vm1669_vm0 = vmmov (!%p213_p2), 0   ;;  %v1670_v5 = vmov (!%p213_p2), 1983009808   ;;  %v293_v7 = vlaneseq (!%p213_p2) }
   0x6   : > { %216 = sbr.rel (%p213_p2) target bundleno = 1435 (0x59b), region = 40  ;;  %s1665_s25 = smov (!%p213_p2), 104   ;;  %1559 = vmatprep.subr.bf16.mxu0 (!%p213_p2), %v1668_v3  ;;  %1565 = vmatprep.subr.bf16.mxu1 (!%p213_p2), %v1668_v3  ;;  %v291_v6 = vunpack.c.l.s4 (!%p213_p2), %v1670_v5  ;;  %v1671_v17 = vmov (!%p213_p2), 1934713408   ;;  %vm781_vm1 = vcmask (!%p213_p2), 64512   ;;  %vm1021_vm3 = vcmask (!%p213_p2), 1043456  }
   0x7   : > { %s1666_s26 = smov (!%p213_p2), 112   ;;  %s1667_s27 = smov (!%p213_p2), 96   ;;  %1561 = vmatprep.mubr.msk.bf16.mxu0 (!%p213_p2), %vm1669_vm0, %v1668_v3  ;;  %1567 = vmatprep.mubr.msk.bf16.mxu1 (!%p213_p2), %vm1669_vm0, %v1668_v3  ;;  %v1750_v11 = vshrl.u32 (!%p213_p2), %v293_v7, 7  ;;  %v308_v18 = vunpack.c.l.s4 (!%p213_p2), %v1671_v17  ;;  %vm1352_vm4 = vcmask (!%p213_p2), 130048   ;;  %vm1354_vm5 = vcmask (!%p213_p2), 195584  }
   0x8   : > { %v292_v10 = vunpack.c.0.s8 (!%p213_p2), %v291_v6  ;;  %s1675_s9 = smov (!%p213_p2), 64   ;;  %s1676_s14 = smov (!%p213_p2), 16   ;;  %vm1373_vm6 = vcmask (!%p213_p2), 261120   ;;  %vm1421_vm7 = vcmask (!%p213_p2), 257024  }
   0x9   : > { %v309_v27 = vunpack.c.0.s8 (!%p213_p2), %v308_v18  ;;  %s1677_s15 = smov (!%p213_p2), 8   ;;  %s1678_s16 = smov (!%p213_p2), 24  }
   0xa   : > { %v1755_v15 = vsub.s32 (!%p213_p2), %v292_v10, %v1750_v11 }
   0xb   : > { %v1766_v39 = vsub.s32 (!%p213_p2), %v309_v27, %v1750_v11 }
   0xd   : > { %s1931_s19 = smov (!%p249_p3, %s1509_s19), 1 }
   0xe   : > { %s1720_s20 = sshll.u32 %s1931_s19, 2  ;;  %s263_s30 = scalar_lea.vmem %s1927_s3, %s1931_s19 }
   0xf   : > { %s256_s23 = scalar_lea.vmem %s1925_s1, %s1720_s20  ;;  %s260_s8 = scalar_lea.vmem %s1926_s2, %s1720_s20 }
  0x10   : > { %v1726_v0 = vld [vmem:[%s256_s23] sm:$0xf]  ;;  %s252_s21 = scalar_lea.vmem %s1924_s0, %s1720_s20 }
  0x11   : > { %271 = vrot.lane.b32.xlu0 %v1726_v0, %s1664_s24  ;;  %275 = vrot.lane.b32.xlu1 %v1726_v0, %s1665_s25  ;;  %v280_v12 = vshrl.u32 %v1726_v0, 16  ;;  %s267_s24 = scalar_lea.vmem %s1929_s5, %s1720_s20 }
  0x15   : > { %273 = vrot.lane.b32.xlu0 %v1726_v0, %s1666_s26  ;;  %419 = vrot.lane.b32.xlu1 %v1726_v0, %s1667_s27 }
  0x83   : > { %v1732_v1 = vpop.permute.xlu0 %271  ;;  %v1735_v2 = vpop.permute.xlu1 %275 }
  0x84   : > { %421 = vrot.lane.b32.xlu0 %v1732_v1, %s1667_s27  ;;  %v287_v8 = vshrl.u32 %v1735_v2, 16  ;;  %v281_v13 = vshrl.u32 %v1732_v1, 16  ;;  %v279_v21 = vpack.i.b16 %v1732_v1, %v1726_v0 }
  0x86   : > { %v282_v16 = vpack.i.b16 %v281_v13, %v280_v12  ;;  %v296_v30 = vrot.slane %v279_v21, %v1755_v15 }
  0x87   : > { %v1739_v4 = vpop.permute.xlu0 %273  ;;  %v420_v20 = vpop.permute.xlu1 %419 }
  0x88   : > { %425 = vrot.lane.b32.xlu0 %v1735_v2, %s1667_s27  ;;  %423 = vrot.lane.b32.xlu1 %v1739_v4, %s1667_s27  ;;  %v286_v9 = vshrl.u32 %v1739_v4, 16  ;;  %v285_v19 = vpack.i.b16 %v1735_v2, %v1739_v4  ;;  %v430_v24 = vshrl.u32 %v420_v20, 16  ;;  %v330_v26 = vrot.slane %v282_v16, %v1755_v15 }
  0x8a   : > { %v288_v14 = vpack.i.b16 %v287_v8, %v286_v9  ;;  %v304_v28 = vrot.slane %v285_v19, %v1755_v15 }
  0x8c   : > { %v338_v22 = vrot.slane %v288_v14, %v1755_v15  ;;  %v305_v40 = vcombine.low %v296_v30, %v304_v28  ;;  %v306_v41 = vcombine.high %v296_v30, %v304_v28  ;;  %v1672_v28 = vmov 0  }
  0x8e   : > { %v339_v31 = vcombine.low %v330_v26, %v338_v22  ;;  %v340_v32 = vcombine.high %v330_v26, %v338_v22  ;;  %v313_v51 = vrot.slane %v305_v40, %v1766_v39  ;;  %v320_v52 = vrot.slane %v306_v41, %v1766_v39 }
  0x90   : > { %v347_v45 = vrot.slane %v339_v31, %v1766_v39  ;;  %v354_v46 = vrot.slane %v340_v32, %v1766_v39  ;;  %v357_v63 = vcombine.low %v313_v51, %v320_v52  ;;  %v1518_v5 = vcombine.high %v313_v51, %v320_v52 }
  0x92   : > { %v382_v57 = vcombine.low %v347_v45, %v354_v46  ;;  %v1519_v58 = vcombine.high %v347_v45, %v354_v46  ;;  %v364_v18 = vrot.slane %v357_v63, %v1755_v15  ;;  %v372_v19 = vrot.slane %v1518_v5, %v1755_v15 }
  0x94   : > { %v389_v12 = vrot.slane %v382_v57, %v1755_v15  ;;  %v397_v17 = vrot.slane %v1519_v58, %v1755_v15  ;;  %v1524_v58 = vld.sshfl [vmem:[%s260_s8] sm:$0x33 pattern:$0x75316420] }
  0xf6   : > { %v422_v23 = vpop.permute.xlu0 %421 }
  0xf7   : > { %v431_v25 = vshrl.u32 %v422_v23, 16  ;;  %v429_v29 = vpack.i.b16 %v422_v23, %v420_v20  ;;  %v398_v23 = vcombine.low %v389_v12, %v397_v17 }
  0xf9   : > { %v432_v35 = vpack.i.b16 %v431_v25, %v430_v24  ;;  %v446_v42 = vrot.slane %v429_v29, %v1755_v15  ;;  %v373_v24 = vcombine.low %v364_v18, %v372_v19  ;;  %v405_v32 = vrot.slane %v398_v23, %v1766_v39 }
  0xfa   : > { %v424_v33 = vpop.permute.xlu1 %423  ;;  %v426_v34 = vpop.permute.xlu0 %425 }
  0xfb   : > { %v436_v36 = vshrl.u32 %v424_v33, 16  ;;  %v435_v37 = vpack.i.b16 %v426_v34, %v424_v33  ;;  %v437_v38 = vshrl.u32 %v426_v34, 16  ;;  %v480_v47 = vrot.slane %v432_v35, %v1755_v15 }
  0xfc   : > { %v380_v35 = vrot.slane %v373_v24, %v1766_v39  ;;  %v406_v46 = vcombine.high %v405_v32, %v1672_v28 }
  0xfd   : > { %v438_v43 = vpack.i.b16 %v437_v38, %v436_v36  ;;  %v454_v44 = vrot.slane %v435_v37, %v1755_v15  ;;  %v411_v38 = vshrl.u32 %v405_v32, 16 }
  0xfe   : > { %v409_v41 = vpack.i.b16 %v405_v32, %v380_v35 }
  0xff   : > { %v455_v48 = vcombine.low %v446_v42, %v454_v44  ;;  %v456_v49 = vcombine.high %v446_v42, %v454_v44  ;;  %v488_v50 = vrot.slane %v438_v43, %v1755_v15  ;;  %v410_v42 = vshrl.u32 %v380_v35, 16 }
 0x101   : > { %v463_v53 = vrot.slane %v455_v48, %v1766_v39  ;;  %v470_v54 = vrot.slane %v456_v49, %v1766_v39  ;;  %v489_v55 = vcombine.low %v480_v47, %v488_v50  ;;  %v490_v56 = vcombine.high %v480_v47, %v488_v50 }
 0x102   : > { %v412_v45 = vpack.i.b16 %v411_v38, %v410_v42  ;;  %v381_v48 = vcombine.high %v380_v35, %v1672_v28  ;;  %v417_v49 = vshrl.u32 %v406_v46, 16 }
 0x103   : > { %v497_v59 = vrot.slane %v489_v55, %v1766_v39  ;;  %v504_v60 = vrot.slane %v490_v56, %v1766_v39  ;;  %v507_v61 = vcombine.low %v463_v53, %v470_v54  ;;  %v1520_v62 = vcombine.high %v463_v53, %v470_v54  ;;  %v720_v55 = vld [vmem:[%s263_s30] sm:$0x1] }
 0x104   : > { %v415_v50 = vpack.i.b16 %v406_v46, %v381_v48  ;;  %v416_v51 = vshrl.u32 %v381_v48, 16  ;;  %v1673_v53 = vmov 1966171168   ;;  %v721_v57 = vsub.f32 1.0, %v720_v55 }
 0x105   : > { %v532_v6 = vcombine.low %v497_v59, %v504_v60  ;;  %v1521_v8 = vcombine.high %v497_v59, %v504_v60  ;;  %v514_v9 = vrot.slane %v507_v61, %v1755_v15  ;;  %v522_v10 = vrot.slane %v1520_v62, %v1755_v15 }
 0x106   : > { %v418_v52 = vpack.i.b16 %v417_v49, %v416_v51  ;;  %v746_v54 = vunpack.c.l.s4 %v1673_v53  ;;  %v726_v60 = vand.u32 127, %v293_v7  ;;  %v732_v61 = vsub.s32 0, %v1750_v11 }
 0x107   : > { %v523_v13 = vcombine.low %v514_v9, %v522_v10  ;;  %v539_v14 = vrot.slane %v532_v6, %v1755_v15  ;;  %v547_v16 = vrot.slane %v1521_v8, %v1755_v15  ;;  %v744_v62 = vcombine.high %v1524_v58, %v1524_v58 }
 0x108   : > { %v747_v56 = vunpack.c.0.s8 %v746_v54  ;;  %v722_v63 = vmul.f32 -1e+09, %v721_v57  ;;  %vm727_vm2 = vcmp.le.s32.totalorder %v726_v60, %v1750_v11  ;;  %v1674_v9 = vmov -1e+09  }
 0x109   : > { %v530_v20 = vrot.slane %v523_v13, %v1766_v39  ;;  %v548_v21 = vcombine.low %v539_v14, %v547_v16  ;;  %v728_v10 = vsel %vm727_vm2, 0.0, %v1674_v9 }
 0x10a   : > { %v750_v59 = vsub.s32 %v747_v56, %v1750_v11  ;;  %v733_v8 = vrot.slane %v722_v63, %v732_v61 }
 0x10b   : > { %v555_v22 = vrot.slane %v548_v21, %v1766_v39  ;;  %v560_v26 = vshrl.u32 %v530_v20, 16  ;;  %v531_v33 = vcombine.high %v530_v20, %v1672_v28 }
 0x10c   : > { %v751_v5 = vrot.slane %v1524_v58, %v750_v59  ;;  %v758_v6 = vrot.slane %v744_v62, %v750_v59  ;;  %v735_v14 = vadd.f32 %v733_v8, %v728_v10 }
 0x10d   : > { %v559_v25 = vpack.i.b16 %v555_v22, %v530_v20  ;;  %v561_v27 = vshrl.u32 %v555_v22, 16  ;;  %v556_v29 = vcombine.high %v555_v22, %v1672_v28  ;;  %v566_v40 = vshrl.u32 %v531_v33, 16 }
 0x10e   : > { %v764_v12 = vrot.slane %v751_v5, %v732_v61  ;;  %v768_v13 = vrot.slane %v758_v6, %v732_v61  ;;  %v759_v19 = vcombine.high %v751_v5, %v751_v5 }
 0x10f   : > { %v786_v30 = vsel %vm781_vm1, %v559_v25, 0  ;;  %v562_v31 = vpack.i.b16 %v561_v27, %v560_v26  ;;  %v567_v36 = vshrl.u32 %v556_v29, 16  ;;  %v565_v37 = vpack.i.b16 %v556_v29, %v531_v33 }
 0x110   : > { %1560 = vmatpush3.bf16.xpose.msra.mxu0 %v786_v30  ;;  %v760_v25 = vcombine.high %v758_v6, %v758_v6  ;;  %v772_v30 = vrot.slane %v759_v19, %v732_v61 }
 0x111   : > { %v832_v34 = vsel %vm781_vm1, %v562_v31, 0  ;;  %1571 = vmatprep.subr.bf16.mxu0 %v1668_v3  ;;  %v568_v43 = vpack.i.b16 %v567_v36, %v566_v40  ;;  %v878_v44 = vsel %vm781_vm1, %v565_v37, 0 }
 0x112   : > { %1566 = vmatpush3.bf16.xpose.msra.mxu1 %v832_v34  ;;  %v776_v32 = vrot.slane %v760_v25, %v732_v61 }
 0x113   : > { %1577 = vmatprep.subr.bf16.mxu1 %v1668_v3  ;;  %v924_v47 = vsel %vm781_vm1, %v568_v43, 0 }
 0x117   : > { %1562 = vmatmul.mubr.msk.bf16.vlgmr.msra.gmra.mrb[0].mxu0 %vm781_vm1, %v409_v41 }
 0x118   : > { %1572 = vmatpush3.bf16.xpose.msra.mxu0 %v878_v44  ;;  %1573 = vmatprep.mubr.msk.bf16.mxu0 %vm1669_vm0, %v1668_v3 }
 0x119   : > { %1568 = vmatmul.mubr.msk.bf16.vlgmr.msra.gmra.mrb[0].mxu1 %vm781_vm1, %v412_v45  ;;  %1583 = vmatprep.subr.bf16.mxu0 %v1668_v3 }
 0x11a   : > { %1578 = vmatpush3.bf16.xpose.msra.mxu1 %v924_v47  ;;  %1579 = vmatprep.mubr.msk.bf16.mxu1 %vm1669_vm0, %v1668_v3 }
 0x11b   : > { %1589 = vmatprep.subr.bf16.mxu1 %v1668_v3 }
 0x11f   : > { %1574 = vmatmul.mubr.msk.bf16.vlgmr.msra.gmra.mrb[4].mxu0 %vm781_vm1, %v415_v50 }
 0x120   : > { %1585 = vmatprep.mubr.msk.bf16.mxu0 %vm1669_vm0, %v1668_v3 }
 0x121   : > { %1580 = vmatmul.mubr.msk.bf16.vlgmr.msra.gmra.mrb[4].mxu1 %vm781_vm1, %v418_v52 }
 0x122   : > { %1591 = vmatprep.mubr.msk.bf16.mxu1 %vm1669_vm0, %v1668_v3 }
 0x1ea   : > { %v822_v16 = vpop.f32.mrb[0].mxu0 }
 0x1eb   : > { %v823_v17 = vadd.f32 %v822_v16, %v764_v12  ;;  %v1563_v18 = vpop.f32.mrb[1].mxu0 }
 0x1ec   : > { %v825_v20 = vpop.f32.mrb[2].mxu0  ;;  %v868_v7 = vpop.f32.mrb[0].mxu1 }
 0x1ed   : > { %v869_v21 = vadd.f32 %v868_v7, %v768_v13  ;;  %v1564_v22 = vpop.f32.mrb[3].mxu0  ;;  %v1569_v23 = vpop.f32.mrb[1].mxu1  ;;  %v966_v24 = vadd.f32 %v823_v17, %v735_v14 }
 0x1ee   : > { %v871_v26 = vpop.f32.mrb[2].mxu1 }
 0x1ef   : > { %v1570_v11 = vpop.f32.mrb[3].mxu1  ;;  %v970_v27 = vsel %vm781_vm1, %v966_v24, -inf  ;;  %v967_v29 = vadd.f32 %v869_v21, %v735_v14 }
 0x1f0   : > { %971 = vmax.xlane.f32.xlu1 %v970_v27 }
 0x1f1   : > { %v973_v31 = vsel %vm781_vm1, %v967_v29, -inf }
 0x1f2   : > { %974 = vmax.xlane.f32.xlu0 %v973_v31  ;;  %v914_v33 = vpop.f32.mrb[4].mxu0 }
 0x1f3   : > { %v915_v34 = vadd.f32 %v914_v33, %v772_v30  ;;  %v1575_v35 = vpop.f32.mrb[5].mxu0 }
 0x1f4   : > { %v917_v36 = vpop.f32.mrb[6].mxu0  ;;  %v960_v37 = vpop.f32.mrb[4].mxu1 }
 0x1f5   : > { %v961_v38 = vadd.f32 %v960_v37, %v776_v32  ;;  %v1576_v40 = vpop.f32.mrb[7].mxu0  ;;  %v1581_v41 = vpop.f32.mrb[5].mxu1  ;;  %v968_v42 = vadd.f32 %v915_v34, %v735_v14 }
 0x1f6   : > { %v963_v43 = vpop.f32.mrb[6].mxu1 }
 0x1f7   : > { %v1582_v44 = vpop.f32.mrb[7].mxu1  ;;  %v976_v45 = vsel %vm781_vm1, %v968_v42, -inf  ;;  %v969_v46 = vadd.f32 %v961_v38, %v735_v14 }
 0x1f8   : > { %977 = vmax.xlane.f32.xlu0 %v976_v45 }
 0x1f9   : > { %v979_v47 = vsel %vm781_vm1, %v969_v46, -inf }
 0x1fa   : > { %980 = vmax.xlane.f32.xlu1 %v979_v47 }
 0x20b   : > { %571 = vrot.lane.b32.xlu1 %v1732_v1, %s1675_s9 }
 0x20e   : > { %569 = vrot.lane.b32.xlu0 %v1726_v0, %s1675_s9 }
 0x27d   : > { %v972_v48 = vpop.xlane.xlu1 %971 }
 0x27e   : > { %v982_v49 = vsub.f32 %v966_v24, %v972_v48 }
 0x27f   : > { %v975_v50 = vpop.xlane.xlu0 %974 }
 0x280   : > { %v986_v51 = vmul.f32 1.442695, %v982_v49  ;;  %v983_v52 = vsub.f32 %v967_v29, %v975_v50 }
 0x282   : > { %1640 = vpow2.f32 %v986_v51  ;;  %v988_v53 = vmul.f32 1.442695, %v983_v52 }
 0x284   : > { %1642 = vpow2.f32 %v988_v53 }
 0x285   : > { %v978_v57 = vpop.xlane.xlu0 %977 }
 0x286   : > { %v984_v59 = vsub.f32 %v968_v42, %v978_v57 }
 0x287   : > { %v981_v0 = vpop.xlane.xlu1 %980 }
 0x288   : > { %v985_v58 = vsub.f32 %v969_v46, %v981_v0  ;;  %v990_v61 = vmul.f32 1.442695, %v984_v59 }
 0x28a   : > { %v992_v60 = vmul.f32 1.442695, %v985_v58 }
 0x28b   : > { %v572_v6 = vpop.permute.xlu1 %571 }
 0x28c   : > { %v1834_v54 = vpop.eup %1640  ;;  %1644 = vpow2.f32 %v992_v60  ;;  %v581_v9 = vshrl.u32 %v572_v6, 16 }
 0x28d   : > { %v994_v55 = vsel %vm781_vm1, %v1834_v54, 0.0  ;;  %1646 = vpow2.f32 %v990_v61 }
 0x28e   : > { %v1838_v56 = vpop.eup %1642  ;;  %995 = vadd.xlane.f32.xlu0 %v994_v55 }
 0x28f   : > { %v997_v1 = vsel %vm781_vm1, %v1838_v56, 0.0 }
 0x290   : > { %998 = vadd.xlane.f32.xlu1 %v997_v1 }
 0x296   : > { %v1844_v62 = vpop.eup %1644 }
 0x297   : > { %v1846_v63 = vpop.eup %1646  ;;  %v1003_v5 = vsel %vm781_vm1, %v1844_v62, 0.0 }
 0x2a1   : > { %573 = vrot.lane.b32.xlu1 %v1739_v4, %s1675_s9  ;;  %v1000_v4 = vsel %vm781_vm1, %v1846_v63, 0.0 }
 0x2a4   : > { %575 = vrot.lane.b32.xlu0 %v1735_v2, %s1675_s9  ;;  %v570_v2 = vpop.permute.xlu0 %569 }
 0x2a5   : > { %v580_v10 = vshrl.u32 %v570_v2, 16  ;;  %v579_v14 = vpack.i.b16 %v572_v6, %v570_v2 }
 0x2a7   : > { %v582_v16 = vpack.i.b16 %v581_v9, %v580_v10  ;;  %v596_v7 = vrot.slane %v579_v14, %v1755_v15  ;;  %v1638_v14 = vld [vmem:[%s1928_s4] sm:$0xff]  }
 0x2a9   : > { %v630_v23 = vrot.slane %v582_v16, %v1755_v15 }
 0x2c3   : > { %1004 = vadd.xlane.f32.xlu0 %v1003_v5 }
 0x2c5   : > { %1001 = vadd.xlane.f32.xlu1 %v1000_v4 }
 0x31b   : > { %v996_v8 = vpop.xlane.xlu0 %995 }
 0x31c   : > { %1648 = vrcp.f32 %v996_v8 }
 0x31d   : > { %v999_v12 = vpop.xlane.xlu1 %998 }
 0x31e   : > { %1650 = vrcp.f32 %v999_v12 }
 0x31f   : > { %v576_v13 = vpop.permute.xlu0 %575 }
 0x320   : > { %v587_v18 = vshrl.u32 %v576_v13, 16 }
 0x321   : > { %v574_v17 = vpop.permute.xlu1 %573 }
 0x322   : > { %v585_v19 = vpack.i.b16 %v576_v13, %v574_v17  ;;  %v586_v20 = vshrl.u32 %v574_v17, 16 }
 0x324   : > { %v588_v21 = vpack.i.b16 %v587_v18, %v586_v20  ;;  %v604_v22 = vrot.slane %v585_v19, %v1755_v15 }
 0x326   : > { %v605_v24 = vcombine.low %v596_v7, %v604_v22  ;;  %v606_v25 = vcombine.high %v596_v7, %v604_v22  ;;  %v638_v26 = vrot.slane %v588_v21, %v1755_v15  ;;  %v1649_v43 = vpop.eup %1648 }
 0x327   : > { %v1010_v49 = vmul.f32 %v1649_v43, %v1834_v54 }
 0x328   : > { %v613_v11 = vrot.slane %v605_v24, %v1766_v39  ;;  %v620_v27 = vrot.slane %v606_v25, %v1766_v39  ;;  %v639_v29 = vcombine.low %v630_v23, %v638_v26  ;;  %v640_v30 = vcombine.high %v630_v23, %v638_v26  ;;  %v1651_v46 = vpop.eup %1650 }
 0x329   : > { %v1011_v55 = vmul.f32 %v1651_v46, %v1838_v56  ;;  %v1014_v61 = vpack.c.bf16 %v1010_v49, %v1010_v49 }
 0x32a   : > { %v647_v31 = vrot.slane %v639_v29, %v1766_v39  ;;  %v654_v32 = vrot.slane %v640_v30, %v1766_v39  ;;  %v657_v33 = vcombine.low %v613_v11, %v620_v27  ;;  %v1522_v34 = vcombine.high %v613_v11, %v620_v27 }
 0x32b   : > { %v1015_v5 = vpack.c.bf16 %v1011_v55, %v1011_v55 }
 0x32c   : > { %v664_v35 = vrot.slane %v657_v33, %v1755_v15  ;;  %v672_v36 = vrot.slane %v1522_v34, %v1755_v15  ;;  %v682_v37 = vcombine.low %v647_v31, %v654_v32  ;;  %v1523_v38 = vcombine.high %v647_v31, %v654_v32 }
 0x32e   : > { %v689_v40 = vrot.slane %v682_v37, %v1755_v15  ;;  %v697_v41 = vrot.slane %v1523_v38, %v1755_v15  ;;  %v673_v42 = vcombine.low %v664_v35, %v672_v36 }
 0x330   : > { %v680_v44 = vrot.slane %v673_v42, %v1766_v39  ;;  %v698_v45 = vcombine.low %v689_v40, %v697_v41  ;;  %v1639_v41 = vld [vmem:[%s1928_s4 + $0x8] sm:$0xff]  }
 0x332   : > { %v705_v47 = vrot.slane %v698_v45, %v1766_v39  ;;  %v681_v48 = vcombine.high %v680_v44, %v1672_v28  ;;  %v710_v51 = vshrl.u32 %v680_v44, 16 }
 0x334   : > { %v709_v50 = vpack.i.b16 %v705_v47, %v680_v44  ;;  %v711_v52 = vshrl.u32 %v705_v47, 16  ;;  %v706_v53 = vcombine.high %v705_v47, %v1672_v28  ;;  %v716_v1 = vshrl.u32 %v681_v48, 16 }
 0x336   : > { %v1023_v0 = vsel %vm1021_vm3, %v709_v50, 0  ;;  %v712_v57 = vpack.i.b16 %v711_v52, %v710_v51  ;;  %v715_v58 = vpack.i.b16 %v706_v53, %v681_v48  ;;  %v717_v59 = vshrl.u32 %v706_v53, 16 }
 0x337   : > { %1584 = vmatpush3.bf16.msra.mxu0 %v1023_v0 }
 0x338   : > { %v1069_v60 = vsel %vm1021_vm3, %v712_v57, 0  ;;  %1595 = vmatprep.subr.bf16.mxu0 %v1668_v3  ;;  %v718_v54 = vpack.i.b16 %v717_v59, %v716_v1  ;;  %v1115_v28 = vsel %vm1021_vm3, %v715_v58, 0 }
 0x339   : > { %1590 = vmatpush3.bf16.msra.mxu1 %v1069_v60 }
 0x33a   : > { %1586 = vmatmul.mubr.msk.bf16.vlgmr.msra.gmra.mrb[8].mxu0 %vm781_vm1, %v1014_v61  ;;  %1601 = vmatprep.subr.bf16.mxu1 %v1668_v3  ;;  %v1161_v56 = vsel %vm1021_vm3, %v718_v54, 0 }
 0x33b   : > { %1596 = vmatpush3.bf16.msra.mxu0 %v1115_v28  ;;  %1597 = vmatprep.mubr.msk.bf16.mxu0 %vm1669_vm0, %v1668_v3 }
 0x33c   : > { %1592 = vmatmul.mubr.msk.bf16.vlgmr.msra.gmra.mrb[8].mxu1 %vm781_vm1, %v1015_v5  ;;  %1607 = vmatprep.subr.bf16.mxu0 %v1668_v3 }
 0x33d   : > { %1602 = vmatpush3.bf16.msra.mxu1 %v1161_v56  ;;  %1603 = vmatprep.mubr.msk.bf16.mxu1 %vm1669_vm0, %v1668_v3 }
 0x350   : > { %v1005_v4 = vpop.xlane.xlu0 %1004 }
 0x351   : > { %1652 = vrcp.f32 %v1005_v4 }
 0x352   : > { %v1002_v2 = vpop.xlane.xlu1 %1001 }
 0x353   : > { %1654 = vrcp.f32 %v1002_v2 }
 0x35b   : > { %v1653_v6 = vpop.eup %1652 }
 0x35c   : > { %v1013_v8 = vmul.f32 %v1653_v6, %v1844_v62 }
 0x35d   : > { %v1655_v9 = vpop.eup %1654 }
 0x35e   : > { %v1012_v10 = vmul.f32 %v1655_v9, %v1846_v63  ;;  %v1017_v12 = vpack.c.bf16 %v1013_v8, %v1013_v8 }
 0x360   : > { %1604 = vmatmul.mubr.msk.bf16.vlgmr.msra.gmra.mrb[12].mxu1 %vm781_vm1, %v1017_v12  ;;  %v1016_v13 = vpack.c.bf16 %v1012_v10, %v1012_v10  ;;  %v1417_v10 = vld [vmem:[%s252_s21] sm:$0xf] }
 0x361   : > { %v1418_v12 = vunpack.c.l.bf16 %v1417_v10 }
 0x362   : > { %1598 = vmatmul.mubr.msk.bf16.vlgmr.msra.gmra.mrb[12].mxu0 %vm781_vm1, %v1016_v13 }
 0x363   : > { %1611 = vmatprep.mubr.msk.bf16.mxu0 %vm1669_vm0, %v1668_v3  ;;  %1608 = vmatpush3.bf16.msra.mxu0 %v1638_v14 }
 0x364   : > { %1609 = vmatprep.subr.bf16.mxu0 %v1668_v3 }
 0x367   : > { %1610 = vmatpush3.bf16.msra.mxu0 %v1639_v41 }
 0x40d   : > { %v1059_v62 = vpop.f32.mrb[8].mxu0 }
 0x40e   : > { %v1587_v16 = vpop.f32.mrb[9].mxu0 }
 0x40f   : > { %v1062_v17 = vpop.f32.mrb[10].mxu0  ;;  %v1105_v63 = vpop.f32.mrb[8].mxu1 }
 0x410   : > { %v1588_v18 = vpop.f32.mrb[11].mxu0  ;;  %v1593_v19 = vpop.f32.mrb[9].mxu1 }
 0x411   : > { %v1108_v20 = vpop.f32.mrb[10].mxu1 }
 0x412   : > { %v1594_v7 = vpop.f32.mrb[11].mxu1 }
 0x433   : > { %v1197_v21 = vpop.f32.mrb[12].mxu1 }
 0x434   : > { %v1219_v22 = vcombine.low %v1105_v63, %v1197_v21  ;;  %v1220_v23 = vcombine.high %v1105_v63, %v1197_v21  ;;  %v1605_v24 = vpop.f32.mrb[13].mxu1 }
 0x435   : > { %v1151_v25 = vpop.f32.mrb[12].mxu0  ;;  %v1200_v26 = vpop.f32.mrb[14].mxu1 }
 0x436   : > { %v1203_v11 = vcombine.low %v1059_v62, %v1151_v25  ;;  %v1204_v27 = vcombine.high %v1059_v62, %v1151_v25  ;;  %v1599_v29 = vpop.f32.mrb[13].mxu0  ;;  %v1606_v30 = vpop.f32.mrb[15].mxu1  ;;  %v1227_v3 = vrot.slane %v1219_v22, %v1755_v15  ;;  %v1234_v32 = vrot.slane %v1220_v23, %v1755_v15 }
 0x437   : > { %v1154_v31 = vpop.f32.mrb[14].mxu0 }
 0x438   : > { %v1211_v33 = vrot.slane %v1203_v11, %v1755_v15  ;;  %v1218_v34 = vrot.slane %v1204_v27, %v1755_v15  ;;  %v1600_v35 = vpop.f32.mrb[15].mxu0 }
 0x43a   : > { %v1235_v36 = vcombine.low %v1211_v33, %v1227_v3  ;;  %v1236_v37 = vcombine.high %v1211_v33, %v1227_v3  ;;  %v1251_v38 = vcombine.low %v1218_v34, %v1234_v32  ;;  %v1252_v40 = vcombine.high %v1218_v34, %v1234_v32 }
 0x43c   : > { %v1243_v42 = vrot.slane %v1235_v36, %v1766_v39  ;;  %v1250_v43 = vrot.slane %v1236_v37, %v1766_v39  ;;  %v1259_v44 = vrot.slane %v1251_v38, %v1766_v39  ;;  %v1266_v45 = vrot.slane %v1252_v40, %v1766_v39 }
 0x43e   : > { %v1271_v46 = vcombine.low %v1243_v42, %v1250_v43  ;;  %v1533_v47 = vcombine.high %v1243_v42, %v1250_v43  ;;  %v1287_v48 = vcombine.low %v1259_v44, %v1266_v45  ;;  %v1534_v49 = vcombine.high %v1259_v44, %v1266_v45 }
 0x440   : > { %v1278_v50 = vrot.slane %v1271_v46, %v1755_v15  ;;  %v1286_v51 = vrot.slane %v1533_v47, %v1755_v15  ;;  %v1294_v52 = vrot.slane %v1287_v48, %v1755_v15  ;;  %v1302_v53 = vrot.slane %v1534_v49, %v1755_v15 }
 0x442   : > { %v1304_v55 = vcombine.high %v1278_v50, %v1286_v51  ;;  %v1320_v1 = vcombine.high %v1294_v52, %v1302_v53  ;;  %v1303_v0 = vcombine.low %v1278_v50, %v1286_v51  ;;  %v1319_v57 = vcombine.low %v1294_v52, %v1302_v53 }
 0x444   : > { %v1318_v58 = vrot.slane %v1304_v55, %v1766_v39  ;;  %v1334_v59 = vrot.slane %v1320_v1, %v1766_v39  ;;  %v1311_v60 = vrot.slane %v1303_v0, %v1766_v39  ;;  %v1327_v61 = vrot.slane %v1319_v57, %v1766_v39 }
 0x446   : > { %v1337_v54 = vcombine.low %v1318_v58, %v1334_v59  ;;  %v1336_v28 = vcombine.high %v1311_v60, %v1327_v61  ;;  %v1338_v5 = vcombine.high %v1318_v58, %v1334_v59  ;;  %v1335_v56 = vcombine.low %v1311_v60, %v1327_v61 }
 0x448   : > { %1344 = vrot.lane.b32.xlu1 %v1337_v54, %s1676_s14  ;;  %1340 = vrot.lane.b32.xlu0 %v1336_v28, %s1677_s15 }
 0x44c   : > { %1348 = vrot.lane.b32.xlu1 %v1338_v5, %s1678_s16 }
 0x4ba   : > { %v1345_v15 = vpop.permute.xlu1 %1344  ;;  %v1341_v4 = vpop.permute.xlu0 %1340 }
 0x4bb   : > { %v1351_v2 = vsel %vm781_vm1, %v1335_v56, %v1341_v4 }
 0x4bc   : > { %v1353_v39 = vsel %vm1352_vm4, %v1351_v2, %v1345_v15 }
 0x4be   : > { %v1349_v6 = vpop.permute.xlu1 %1348 }
 0x4bf   : > { %v1355_v8 = vsel %vm1354_vm5, %v1353_v39, %v1349_v6 }
 0x4c0   : > { %v1356_v9 = vpack.c.bf16 %v1355_v8, %v1355_v8 }
 0x4c2   : > { %1612 = vmatmul.mubr.msk.bf16.vlgmr.msra.gmra.mrb[16].mxu0 %vm1373_vm6, %v1356_v9 }
 0x595   : > { %v1411_v13 = vpop.f32.mrb[16].mxu0 }
 0x596   : > { %v1419_v14 = vadd.f32 %v1418_v12, %v1411_v13  ;;  %v1613_v62 = vpop.f32.mrb[17].mxu0 }
 0x597   : > { %v1414_v16 = vpop.f32.mrb[18].mxu0 }
 0x598   : > { %v1420_v17 = vpack.c.bf16 %v1419_v14, %v1419_v14  ;;  %v1614_v63 = vpop.f32.mrb[19].mxu0 }
 0x59a   : > { %1422 = vst.msk [vmem:[%s267_s24] sm:$0xf] %vm1421_vm7, %v1420_v17 }
 0x59b PF: > { %s15_s18 = sadd.s32 1, %s1662_s18  }
 0x59c   : > { %p12_p4 = scmp.ge.s32.totalorder %s15_s18, 4  }
 0x59e   :  { %14 = sbr.rel (!%p12_p4) target bundleno = 1 (0x1), region = 79 }

</bundles_post_ra>
